<compile_context>
chip_gen: v6e
topology: v6e:2x2x1
jax: 0.10.0
libtpu: 0.0.40
codegen_flags: <defaults>
</compile_context>

<pallas_src>
from functools import partial

import numpy as np
import jax
import jax.numpy as jnp
from jax.experimental import pallas as pl
from jax.experimental.pallas import tpu as pltpu

LANE = 128
SUB = 8


def _roundup(a, m):
    return ((a + m - 1) // m) * m


def _vmem_capacity_bytes():
    """Physical VMEM per TensorCore; conservative 64 MiB fallback (v7x-safe)."""
    try:
        info = pltpu.get_tpu_info()
        cap = int(getattr(info, "vmem_capacity_bytes", 0) or 0)
        if cap > 0:
            return cap
    except Exception:
        pass
    return 64 * 1024 * 1024


def uncertainty_kernel(x_ref, outf_ref, w1_ref, w2_ref, fcw_ref, fc2w_ref, b_ref,
                       logsigma_ref, attn_ref, *, mxu_pool):
    """One batch tile: attention-pool x, then logsigma = fc(pool) + fc2(out)."""
    TB, L, D = x_ref.shape
    d_h = w1_ref.shape[1]
    cdtype = x_ref.dtype

    x3 = x_ref[...]                                                     # (TB, L, D)

    # ---- attention scores: h = tanh(x @ W1) --------------------------------
    # Merge (batch, seq) rows into one big MXU matmul (M = TB*L).  The merge is
    # layout-free when L is a multiple of the sublane pack (8 f32 / 16 bf16).
    # TODO(synk): for L % pack != 0 this reshape may emit a VMEM copy of the x
    #             tile; a 3-D einsum('bld,dh->blh') path could avoid it.
    h3 = jnp.tanh(
        jnp.dot(x3.reshape(TB * L, D), w1_ref[...],
                preferred_element_type=jnp.float32)).reshape(TB, L, d_h)

    # logits[b, l] = <h3[b, l, :], w2>   (lane reduce over d_h)
    logits = jnp.sum(h3 * w2_ref[...].astype(jnp.float32), axis=-1)     # (TB, L) f32

    # ---- softmax over the sequence axis (lane reduce over L) ---------------
    m = jnp.max(logits, axis=-1, keepdims=True)
    e = jnp.exp(logits - m)
    denom = jnp.sum(e, axis=-1, keepdims=True)
    attn = e / denom                                                     # (TB, L) f32

    # attn is stored at its exact width: the HBM write is B*L*4 bytes; for
    # L << 128 a masked tail vst is far cheaper than 128/L x write amplification.
    attn_ref[...] = attn.astype(attn_ref.dtype)

    # ---- weighted pooling: residual[b, d] = sum_l attn[b, l] * x[b, l, d] ---
    if mxu_pool:
        # Long sequences: batched MXU contraction over L; avoids materialising
        # the (TB, L, D) f32 product in VMEM.
        attn_row = attn.astype(cdtype)[:, None, :]                       # (TB, 1, L)
        residual = jnp.einsum('bql,bld->bqd', attn_row, x3,
                              preferred_element_type=jnp.float32)[:, 0, :]
    else:
        # Short sequences: VPU scale + sublane reduce (an M=1 batched matmul
        # would use <1% of the MXU rows).
        residual = jnp.sum(attn[:, :, None] * x3.astype(jnp.float32), axis=1)

    # ---- output head: two accumulating MXU dots (no lane-axis concat) -------
    logsigma = (jnp.dot(residual.astype(cdtype), fcw_ref[...],
                        preferred_element_type=jnp.float32)
                + jnp.dot(outf_ref[...], fc2w_ref[...],
                          preferred_element_type=jnp.float32)
                + b_ref[...])                                            # (TB, d_out)
    logsigma_ref[...] = logsigma.astype(logsigma_ref.dtype)


def uncertainty_module_image(out_feat, x, w1, w2, fc_w, fc_b, fc2_w, fc2_b,
                             *, block_b=None):
    """Forward of UncertaintyModuleImage (pad_mask=None path).

    out_feat: (B, d_in); x: (B, L, d_in); weights in PyTorch (out, in) layout.
    Returns {'logsigma': (B, d_out) f32, 'attention': (B, L, 1) f32}.
    """
    B, L, d_in = x.shape
    d_h = w1.shape[0]
    d_out = fc_w.shape[0]
    cdtype = x.dtype            # honor caller dtype (bf16 halves HBM traffic)
    itemsize = jnp.dtype(cdtype).itemsize

    # ---- weight prep (cache these in a real deployment) ---------------------
    w1_t = w1.T.astype(cdtype)                               # (d_in, d_h)
    w2_r = w2.astype(cdtype)                                 # (1, d_h)
    fcw_t = fc_w.T.astype(cdtype)                            # (d_in, d_out)
    fc2w_t = fc2_w.T.astype(cdtype)                          # (d_in, d_out)
    bias = (fc_b + fc2_b).reshape(1, d_out).astype(jnp.float32)

    x_c = x.astype(cdtype)
    out_c = out_feat.astype(cdtype)

    # Pooling path: VPU scale+reduce for short sequences, batched MXU
    # contraction once the (TB, L, D) f32 product would get large.
    # TODO(synk): threshold should be retuned per TPU generation / made D-aware.
    mxu_pool = (L * d_in > 32 * 1024)

    # ---- VMEM model (per batch row), incl. in-kernel f32 temporaries --------
    L_s, L_l = _roundup(L, SUB), _roundup(L, LANE)
    din_s, din_l = _roundup(d_in, SUB), _roundup(d_in, LANE)
    dh_l, dout_l = _roundup(d_h, LANE), _roundup(d_out, LANE)

    io_row = (3 * L_s * din_l * itemsize        # x tile (3-deep pipeline)
              + 2 * din_l * itemsize            # out_feat tile
              + 2 * dout_l * 4                  # logsigma out block
              + 2 * L_l * 4)                    # attn out block
    tmp_row = (L_s * dh_l * 4                   # h3 (f32)
               + 4 * L_l * 4                    # logits / e / attn / scratch
               + 2 * din_l * 4)                 # residual + head accumulator
    if not mxu_pool:
        tmp_row += L_s * din_l * 4              # (TB, L, D) f32 product
        if itemsize < 4:
            tmp_row += L_s * din_l * 4          # f32 upcast of the x tile
    bytes_per_row = io_row + tmp_row

    weight_bytes = 2 * ((din_s * dh_l + SUB * dh_l + 2 * din_s * dout_l) * itemsize
                        + SUB * dout_l * 4)

    # Chip-aware VMEM budget: ~96 MiB on 128 MiB parts (v5e/v6e), ~48 MiB on
    # v7x's 64 MiB/TC, minus weights and compiler-scratch headroom.
    vmem_cap = _vmem_capacity_bytes()
    vmem_limit = max(32 << 20, min(vmem_cap * 3 // 4, vmem_cap - (8 << 20)))
    avail = max(bytes_per_row, vmem_limit - weight_bytes - (4 << 20))
    max_tb = max(1, avail // bytes_per_row)

    # ---- batch tile: the kernel is HBM-read-bound, so keep >= 4 grid steps so
    #      Pallas pipelines the x DMA (a 1-step grid has zero DMA/compute
    #      overlap and idles the second TensorCore on v7x).
    if block_b is not None:
        TB = max(1, int(block_b))
    elif max_tb >= SUB:
        tb_target = _roundup(max(1, -(-B // 4)), SUB)       # ~B/4, sublane-aligned
        TB = max(SUB, min(tb_target, (max_tb // SUB) * SUB))
    else:
        TB = int(max_tb)        # pathological: a single row nearly fills VMEM

    B_pad = -(-B // TB) * TB
    steps = B_pad // TB
    if B_pad != B:              # zero rows are harmless (uniform softmax, finite out)
        x_c = jnp.pad(x_c, ((0, B_pad - B), (0, 0), (0, 0)))
        out_c = jnp.pad(out_c, ((0, B_pad - B), (0, 0)))

    # x dominates HBM traffic: deepen only its pipeline to 3 buffers.
    x_spec = pl.BlockSpec((TB, L, d_in), lambda b: (b, 0, 0))
    if steps >= 3:
        try:
            x_spec = pl.BlockSpec((TB, L, d_in), lambda b: (b, 0, 0),
                                  pipeline_mode=pl.Buffered(3))
        except Exception:       # pipeline_mode unavailable: keep default 2-deep
            pass

    kernel = partial(uncertainty_kernel, mxu_pool=mxu_pool)
    logsigma, attn = pl.pallas_call(
        kernel,
        grid=(steps,),
        in_specs=[
            x_spec,                                              # x: tiled over batch
            pl.BlockSpec((TB, d_in), lambda b: (b, 0)),          # out_feat: tiled
            pl.BlockSpec((d_in, d_h), lambda b: (0, 0)),         # weights: VMEM-resident
            pl.BlockSpec((1, d_h), lambda b: (0, 0)),
            pl.BlockSpec((d_in, d_out), lambda b: (0, 0)),
            pl.BlockSpec((d_in, d_out), lambda b: (0, 0)),
            pl.BlockSpec((1, d_out), lambda b: (0, 0)),
        ],
        out_specs=(
            pl.BlockSpec((TB, d_out), lambda b: (b, 0)),
            pl.BlockSpec((TB, L), lambda b: (b, 0)),
        ),
        out_shape=(
            jax.ShapeDtypeStruct((B_pad, d_out), jnp.float32),
            jax.ShapeDtypeStruct((B_pad, L), jnp.float32),
        ),
        compiler_params=pltpu.CompilerParams(
            dimension_semantics=("parallel",),   # independent batch tiles (2 TCs on v7x)
            vmem_limit_bytes=int(vmem_limit),
        ),
    )(x_c, out_c, w1_t, w2_r, fcw_t, fc2w_t, bias)

    logsigma = logsigma[:B]
    attn = attn[:B].reshape(B, L, 1)              # torch returns (B, L, n_head=1)
    return {'logsigma': logsigma, 'attention': attn}


def reference_forward(out_feat, x, w1, w2, fc_w, fc_b, fc2_w, fc2_b):
    """Pure-JAX reference matching the PyTorch module (pad_mask=None)."""
    h = jnp.tanh(x @ w1.T)                                     # (B, L, d_h)
    logits = h @ w2.T                                          # (B, L, 1)
    attn = jax.nn.softmax(logits, axis=1)                      # softmax over seq
    residual = jnp.einsum('blh,bld->bhd', attn, x)[:, 0, :]    # (B, d_in)
    logsigma = residual @ fc_w.T + fc_b + out_feat @ fc2_w.T + fc2_b
    return logsigma, attn


if __name__ == "__main__":
    # Run both the kernel and the reference with full-f32 MXU passes so they
    # can be compared at tight tolerance regardless of the default precision.
    jax.config.update("jax_default_matmul_precision", "highest")

    def xavier(k, shape):  # shape = (fan_out, fan_in), like nn.Linear.weight
        fan_out, fan_in = shape
        bound = float(np.sqrt(6.0 / (fan_in + fan_out)))
        return jax.random.uniform(k, shape, jnp.float32, -bound, bound)

    def run_case(seed, B, L, d_in, d_h, d_out, block_b=None, rtol=1e-5, atol=1e-5):
        key = jax.random.PRNGKey(seed)
        ks = jax.random.split(key, 7)
        w1 = xavier(ks[0], (d_h, d_in))
        w2 = xavier(ks[1], (1, d_h))
        fc_w = xavier(ks[2], (d_out, d_in))
        fc_b = jnp.zeros((d_out,), jnp.float32)
        fc2_w = xavier(ks[3], (d_out, d_in))
        fc2_b = jax.random.uniform(ks[4], (d_out,), jnp.float32,
                                   -1.0 / np.sqrt(d_in), 1.0 / np.sqrt(d_in))
        x = jax.random.normal(ks[5], (B, L, d_in), jnp.float32)
        out_feat = jax.random.normal(ks[6], (B, d_in), jnp.float32)

        res = uncertainty_module_image(out_feat, x, w1, w2, fc_w, fc_b,
                                       fc2_w, fc2_b, block_b=block_b)
        logsigma = jax.block_until_ready(res['logsigma'])
        attn = jax.block_until_ready(res['attention'])

        ref_ls, ref_attn = reference_forward(out_feat, x, w1, w2,
                                             fc_w, fc_b, fc2_w, fc2_b)
        np.testing.assert_allclose(np.asarray(logsigma), np.asarray(ref_ls),
                                   rtol=rtol, atol=atol)
        np.testing.assert_allclose(np.asarray(attn), np.asarray(ref_attn),
                                   rtol=rtol, atol=atol)
        assert logsigma.shape == (B, d_out) and attn.shape == (B, L, 1)

    # 1) small shapes (batch padded to one 8-row tile, VPU pooling path)
    run_case(seed=0, B=2, L=8, d_in=32, d_h=32, d_out=32)
    # 2) explicit multi-step grid + batch-padding path (TB=8, 20 -> 24, grid=(3,))
    run_case(seed=1, B=20, L=8, d_in=32, d_h=32, d_out=32, block_b=8)
    # 3) default tiling (TB=8, grid=(2,)) + MXU pooling path for a longer sequence
    run_case(seed=2, B=16, L=128, d_in=512, d_h=128, d_out=64,
             rtol=5e-4, atol=5e-4)

    print("KERNEL_OK")
</pallas_src>

<mosaic_0001>
module attributes {stable_mosaic.version = 11 : i64} {
  func.func @uncertainty_kernel(%arg0: i32, %arg1: memref<8x8x32xf32, #tpu.memory_space<vmem>>, %arg2: memref<8x32xf32, #tpu.memory_space<vmem>>, %arg3: memref<32x32xf32, #tpu.memory_space<vmem>>, %arg4: memref<1x32xf32, #tpu.memory_space<vmem>>, %arg5: memref<32x32xf32, #tpu.memory_space<vmem>>, %arg6: memref<32x32xf32, #tpu.memory_space<vmem>>, %arg7: memref<1x32xf32, #tpu.memory_space<vmem>>, %arg8: memref<8x32xf32, #tpu.memory_space<vmem>>, %arg9: memref<8x8xf32, #tpu.memory_space<vmem>>) attributes {dimension_semantics = [#tpu.dimension_semantics<parallel>], iteration_bounds = array<i64: 1>, scalar_prefetch = 0 : i64, scratch_operands = 0 : i64, tpu.core_type = #tpu.core_type<tc>, window_params = [{transform_indices = @transform_0, window_bounds = array<i64: 8, 8, 32>}, {transform_indices = @transform_1, window_bounds = array<i64: 8, 32>}, {pipeline_mode = #tpu.pipeline_mode<synchronous>, transform_indices = @transform_2, window_bounds = array<i64: 32, 32>}, {pipeline_mode = #tpu.pipeline_mode<synchronous>, transform_indices = @transform_3, window_bounds = array<i64: 1, 32>}, {pipeline_mode = #tpu.pipeline_mode<synchronous>, transform_indices = @transform_4, window_bounds = array<i64: 32, 32>}, {pipeline_mode = #tpu.pipeline_mode<synchronous>, transform_indices = @transform_5, window_bounds = array<i64: 32, 32>}, {pipeline_mode = #tpu.pipeline_mode<synchronous>, transform_indices = @transform_6, window_bounds = array<i64: 1, 32>}, {transform_indices = @transform_7, window_bounds = array<i64: 8, 32>}, {transform_indices = @transform_8, window_bounds = array<i64: 8, 8>}]} {
    %c0 = arith.constant 0 : index
    %c0_0 = arith.constant 0 : index
    %c0_1 = arith.constant 0 : index
    %0 = vector.load %arg1[%c0, %c0_0, %c0_1] : memref<8x8x32xf32, #tpu.memory_space<vmem>>, vector<8x8x32xf32>
    %1 = vector.shape_cast %0 : vector<8x8x32xf32> to vector<64x32xf32>
    %c0_2 = arith.constant 0 : index
    %c0_3 = arith.constant 0 : index
    %2 = vector.load %arg3[%c0_2, %c0_3] : memref<32x32xf32, #tpu.memory_space<vmem>>, vector<32x32xf32>
    %cst = arith.constant dense<0.000000e+00> : vector<64x32xf32>
    %3 = tpu.matmul %1, %2, %cst {dimension_numbers = #tpu.dot_dimension_numbers<[1], [0], [0], [1], [0, 0, 1, 1], [], []>, precision = #tpu.contract_precision<fp32>} : vector<64x32xf32>, vector<32x32xf32>, vector<64x32xf32> -> vector<64x32xf32>
    %4 = math.tanh %3 : vector<64x32xf32>
    %5 = vector.shape_cast %4 : vector<64x32xf32> to vector<8x8x32xf32>
    %c0_4 = arith.constant 0 : index
    %c0_5 = arith.constant 0 : index
    %6 = vector.load %arg4[%c0_4, %c0_5] : memref<1x32xf32, #tpu.memory_space<vmem>>, vector<1x32xf32>
    %7 = vector.shape_cast %6 : vector<1x32xf32> to vector<1x1x32xf32>
    %8 = vector.broadcast %7 : vector<1x1x32xf32> to vector<8x8x32xf32>
    %9 = arith.mulf %5, %8 : vector<8x8x32xf32>
    %cst_6 = arith.constant dense<0.000000e+00> : vector<8x8xf32>
    %10 = vector.multi_reduction <add>, %9, %cst_6 [2] : vector<8x8x32xf32> to vector<8x8xf32>
    %cst_7 = arith.constant dense<0xFF800000> : vector<8xf32>
    %11 = vector.multi_reduction <maximumf>, %10, %cst_7 [1] : vector<8x8xf32> to vector<8xf32>
    %12 = vector.shape_cast %11 : vector<8xf32> to vector<8x1xf32>
    %13 = vector.broadcast %12 : vector<8x1xf32> to vector<8x8xf32>
    %14 = arith.subf %10, %13 : vector<8x8xf32>
    %15 = math.exp %14 : vector<8x8xf32>
    %cst_8 = arith.constant dense<0.000000e+00> : vector<8xf32>
    %16 = vector.multi_reduction <add>, %15, %cst_8 [1] : vector<8x8xf32> to vector<8xf32>
    %17 = vector.shape_cast %16 : vector<8xf32> to vector<8x1xf32>
    %18 = vector.broadcast %17 : vector<8x1xf32> to vector<8x8xf32>
    %19 = arith.divf %15, %18 : vector<8x8xf32>
    %c0_9 = arith.constant 0 : index
    %c0_10 = arith.constant 0 : index
    %20 = vector.load %arg9[%c0_9, %c0_10] : memref<8x8xf32, #tpu.memory_space<vmem>>, vector<8x8xf32>
    tpu.vector_store %arg9[%c0_9, %c0_10], %19 {strides = array<i32>} : memref<8x8xf32, #tpu.memory_space<vmem>>, vector<8x8xf32>,
    %21 = vector.shape_cast %19 : vector<8x8xf32> to vector<8x8x1xf32>
    %22 = vector.broadcast %21 : vector<8x8x1xf32> to vector<8x8x32xf32>
    %23 = arith.mulf %22, %0 : vector<8x8x32xf32>
    %cst_11 = arith.constant dense<0.000000e+00> : vector<8x32xf32>
    %24 = vector.multi_reduction <add>, %23, %cst_11 [1] : vector<8x8x32xf32> to vector<8x32xf32>
    %c0_12 = arith.constant 0 : index
    %c0_13 = arith.constant 0 : index
    %25 = vector.load %arg5[%c0_12, %c0_13] : memref<32x32xf32, #tpu.memory_space<vmem>>, vector<32x32xf32>
    %cst_14 = arith.constant dense<0.000000e+00> : vector<8x32xf32>
    %26 = tpu.matmul %24, %25, %cst_14 {dimension_numbers = #tpu.dot_dimension_numbers<[1], [0], [0], [1], [0, 0, 1, 1], [], []>, precision = #tpu.contract_precision<fp32>} : vector<8x32xf32>, vector<32x32xf32>, vector<8x32xf32> -> vector<8x32xf32>
    %c0_15 = arith.constant 0 : index
    %c0_16 = arith.constant 0 : index
    %27 = vector.load %arg2[%c0_15, %c0_16] : memref<8x32xf32, #tpu.memory_space<vmem>>, vector<8x32xf32>
    %c0_17 = arith.constant 0 : index
    %c0_18 = arith.constant 0 : index
    %28 = vector.load %arg6[%c0_17, %c0_18] : memref<32x32xf32, #tpu.memory_space<vmem>>, vector<32x32xf32>
    %cst_19 = arith.constant dense<0.000000e+00> : vector<8x32xf32>
    %29 = tpu.matmul %27, %28, %cst_19 {dimension_numbers = #tpu.dot_dimension_numbers<[1], [0], [0], [1], [0, 0, 1, 1], [], []>, precision = #tpu.contract_precision<fp32>} : vector<8x32xf32>, vector<32x32xf32>, vector<8x32xf32> -> vector<8x32xf32>
    %30 = arith.addf %26, %29 : vector<8x32xf32>
    %c0_20 = arith.constant 0 : index
    %c0_21 = arith.constant 0 : index
    %31 = vector.load %arg7[%c0_20, %c0_21] : memref<1x32xf32, #tpu.memory_space<vmem>>, vector<1x32xf32>
    %32 = vector.broadcast %31 : vector<1x32xf32> to vector<8x32xf32>
    %33 = arith.addf %30, %32 : vector<8x32xf32>
    %c0_22 = arith.constant 0 : index
    %c0_23 = arith.constant 0 : index
    %34 = vector.load %arg8[%c0_22, %c0_23] : memref<8x32xf32, #tpu.memory_space<vmem>>, vector<8x32xf32>
    tpu.vector_store %arg8[%c0_22, %c0_23], %33 {strides = array<i32>} : memref<8x32xf32, #tpu.memory_space<vmem>>, vector<8x32xf32>,
    return
  }
  func.func @transform_0(%arg0: i32) -> (i32, i32, i32) {
    %c0_i32 = arith.constant 0 : i32
    %c0_i32_0 = arith.constant 0 : i32
    %c0_i32_1 = arith.constant 0 : i32
    return %arg0, %c0_i32, %c0_i32_0 : i32, i32, i32
  }
  func.func @transform_1(%arg0: i32) -> (i32, i32) {
    %c0_i32 = arith.constant 0 : i32
    %c0_i32_0 = arith.constant 0 : i32
    return %arg0, %c0_i32 : i32, i32
  }
  func.func @transform_2(%arg0: i32) -> (i32, i32) {
    %c0_i32 = arith.constant 0 : i32
    %c0_i32_0 = arith.constant 0 : i32
    %c0_i32_1 = arith.constant 0 : i32
    return %c0_i32, %c0_i32_0 : i32, i32
  }
  func.func @transform_3(%arg0: i32) -> (i32, i32) {
    %c0_i32 = arith.constant 0 : i32
    %c0_i32_0 = arith.constant 0 : i32
    %c0_i32_1 = arith.constant 0 : i32
    return %c0_i32, %c0_i32_0 : i32, i32
  }
  func.func @transform_4(%arg0: i32) -> (i32, i32) {
    %c0_i32 = arith.constant 0 : i32
    %c0_i32_0 = arith.constant 0 : i32
    %c0_i32_1 = arith.constant 0 : i32
    return %c0_i32, %c0_i32_0 : i32, i32
  }
  func.func @transform_5(%arg0: i32) -> (i32, i32) {
    %c0_i32 = arith.constant 0 : i32
    %c0_i32_0 = arith.constant 0 : i32
    %c0_i32_1 = arith.constant 0 : i32
    return %c0_i32, %c0_i32_0 : i32, i32
  }
  func.func @transform_6(%arg0: i32) -> (i32, i32) {
    %c0_i32 = arith.constant 0 : i32
    %c0_i32_0 = arith.constant 0 : i32
    %c0_i32_1 = arith.constant 0 : i32
    return %c0_i32, %c0_i32_0 : i32, i32
  }
  func.func @transform_7(%arg0: i32) -> (i32, i32) {
    %c0_i32 = arith.constant 0 : i32
    %c0_i32_0 = arith.constant 0 : i32
    return %arg0, %c0_i32 : i32, i32
  }
  func.func @transform_8(%arg0: i32) -> (i32, i32) {
    %c0_i32 = arith.constant 0 : i32
    %c0_i32_0 = arith.constant 0 : i32
    return %arg0, %c0_i32 : i32, i32
  }
}

</mosaic_0001>

<bundles_post_ra>
// kernel: tpu_custom_call.1
= control target key start
LH: loop header
LB: loop body
LE: loop exit
PB: predicated region body
PF: predicated region fallthrough
CT: control target
= control target key end

     0   :  { %14 = vsyncpa [#allocation3], 0  ;;  %s3651_s0 = inlined_call_operand.hbm [shape: f32[8,8,32], index: 0, kind: input, shape index: {}]   ;;  %s3652_s1 = inlined_call_operand.hbm [shape: f32[8,32], index: 1, kind: input, shape index: {}]   ;;  %s3653_s2 = inlined_call_operand.hbm [shape: f32[32,32], index: 2, kind: input, shape index: {}]   ;;  %s3654_s3 = inlined_call_operand.vmem [shape: f32[1,32], index: 3, kind: input, shape index: {}]   ;;  %s3655_s4 = inlined_call_operand.hbm [shape: f32[32,32], index: 4, kind: input, shape index: {}]   ;;  %s3656_s5 = inlined_call_operand.hbm [shape: f32[32,32], index: 5, kind: input, shape index: {}]   ;;  %s3657_s6 = inlined_call_operand.vmem [shape: f32[1,32], index: 6, kind: input, shape index: {}]   ;;  %s3658_s7 = inlined_call_operand.hbm [shape: f32[8,32], index: 7, kind: output, shape index: {0}]   ;;  %s3659_s8 = inlined_call_operand.hbm [shape: f32[8,8], index: 8, kind: output, shape index: {1}]  }
   0x1   :  { %15 = vsyncpa [#allocation6], 0 }
   0x2   :  { %16 = vsyncpa [#allocation9], 0 }
   0x3   :  { %17 = vsyncpa [#allocation4], 0 }
   0x4   :  { %18 = vsyncpa [#allocation13], 0  ;;  %s3014_s27 = smov [#allocation5]  }
   0x5   :  { %s37_s28 = sshll.u32 %s3014_s27, 4  ;;  %s38_s28 = int_to_ptr.vmem [resolvable:$true] %s37_s28 }
   0x6   :  { %s2872_s29 = scalar_lea.vmem %s38_s28, 128  ;;  %p2877_p1 = scmp.lt.s32.totalorder %s38_s28, %s38_s28 }
   0x7   :  { %p2873_p0 = scmp.ne.s32.totalorder %s38_s28, %s2872_s29  ;;  %p2878_p2 = scmp.lt.s32.totalorder %s2872_s29, %s2872_s29 }
   0x9   :  { %p2879_p3 = por %p2878_p2, %p2877_p1 }
   0xb   :  { %p2880_p4 = pnand %p2879_p3, %p2873_p0 }
   0xd   :  { %2883 = shalt.err (!%p2880_p4)
}
   0xe   :  { %40 = dma.hbm_to_vmem [thread:$0]  %s3652_s1, 128, %s38_s28, [#allocation6]  }
   0xf   :  { %s3015_s10 = smov [#allocation8]   ;;  %s3016_s12 = smov [#allocation2]  }
  0x10   :  { %s60_s11 = sshll.u32 %s3015_s10, 4  ;;  %s24_s13 = sshll.u32 %s3016_s12, 4  ;;  %s61_s11 = int_to_ptr.vmem [resolvable:$true] %s60_s11  ;;  %s25_s13 = int_to_ptr.vmem [resolvable:$true] %s24_s13 }
  0x11   :  { %s2892_s14 = scalar_lea.vmem %s61_s11, 512  ;;  %p2897_p6 = scmp.lt.s32.totalorder %s61_s11, %s61_s11 }
  0x12   :  { %p2893_p5 = scmp.ne.s32.totalorder %s61_s11, %s2892_s14  ;;  %p2898_p7 = scmp.lt.s32.totalorder %s2892_s14, %s2892_s14 }
  0x14   :  { %p2899_p8 = por %p2898_p7, %p2897_p6 }
  0x16   :  { %p2900_p9 = pnand %p2899_p8, %p2893_p5 }
  0x18   :  { %2903 = shalt.err (!%p2900_p9)
}
  0x19   :  { %s3017_s15 = smov 128   ;;  %s3018_s16 = smov 8  }
  0x1a   :  { %66 = dma.hbm_to_vmem [thread:$0]  %s3655_s4, 512, %s61_s11, [#allocation9], %s3017_s15, %s3017_s15, %s3018_s16  }
  0x1b   :  { %s2912_s1 = scalar_lea.vmem %s25_s13, 1024  ;;  %p2917_p11 = scmp.lt.s32.totalorder %s25_s13, %s25_s13 }
  0x1c   :  { %p2913_p10 = scmp.ne.s32.totalorder %s25_s13, %s2912_s1  ;;  %p2918_p12 = scmp.lt.s32.totalorder %s2912_s1, %s2912_s1 }
  0x1e   :  { %p2919_p13 = por %p2918_p12, %p2917_p11 }
  0x20   :  { %p2920_p0 = pnand %p2919_p13, %p2913_p10 }
  0x22   :  { %2923 = shalt.err (!%p2920_p0)
}
  0x23   :  { %30 = dma.hbm_to_vmem [thread:$0]  %s3651_s0, 1024, %s25_s13, [#allocation3], %s3017_s15, %s3017_s15, %s3018_s16  }
  0x24   :  { %s3019_s21 = smov [#allocation7]   ;;  %s3020_s23 = smov [#allocation10]  }
  0x25   :  { %s46_s22 = sshll.u32 %s3019_s21, 4  ;;  %s72_s4 = sshll.u32 %s3020_s23, 4  ;;  %s47_s22 = int_to_ptr.vmem [resolvable:$true] %s46_s22  ;;  %s73_s4 = int_to_ptr.vmem [resolvable:$true] %s72_s4 }
  0x26   :  { %s2932_s24 = scalar_lea.vmem %s47_s22, 512  ;;  %p2937_p2 = scmp.lt.s32.totalorder %s47_s22, %s47_s22 }
  0x27   :  { %p2933_p1 = scmp.ne.s32.totalorder %s47_s22, %s2932_s24  ;;  %p2938_p3 = scmp.lt.s32.totalorder %s2932_s24, %s2932_s24 }
  0x29   :  { %p2939_p4 = por %p2938_p3, %p2937_p2 }
  0x2b   :  { %p2940_p5 = pnand %p2939_p4, %p2933_p1 }
  0x2d   :  { %2943 = shalt.err (!%p2940_p5)
}
  0x2e   :  { %52 = dma.hbm_to_vmem [thread:$0]  %s3653_s2, 512, %s47_s22, [#allocation6], %s3017_s15, %s3017_s15, %s3018_s16  }
  0x2f   :  { %s2952_s0 = scalar_lea.vmem %s73_s4, 512  ;;  %p2957_p7 = scmp.lt.s32.totalorder %s73_s4, %s73_s4 }
  0x30   :  { %p2953_p6 = scmp.ne.s32.totalorder %s73_s4, %s2952_s0  ;;  %p2958_p8 = scmp.lt.s32.totalorder %s2952_s0, %s2952_s0 }
  0x32   :  { %p2959_p9 = por %p2958_p8, %p2957_p7 }
  0x34   :  { %p2960_p10 = pnand %p2959_p9, %p2953_p6 }
  0x36   :  { %2963 = shalt.err (!%p2960_p10)
}
  0x37   :  { %78 = dma.hbm_to_vmem [thread:$0]  %s3656_s5, 512, %s73_s4, [#allocation9], %s3017_s15, %s3017_s15, %s3018_s16  }
  0x38   :  { %3004 = dma.done.wait [#allocation3], 1024  }
  0x39   :  { %3005 = vsyncadd [#allocation3], 4294966272 }
  0x3a   :  { %3006 = dma.done.wait [#allocation6], 640  }
  0x3b   :  { %3007 = vsyncadd [#allocation6], 4294966656 }
  0x3c   :  { %3008 = dma.done.wait [#allocation9], 1024  }
  0x3d   :  { %3009 = vsyncadd [#allocation9], 4294966272  ;;  %vm108_vm0 = vcmask 261120   ;;  %v107_v0 = vld [vmem:[#allocation7 + $0x18] sm:$0xff]  ;;  %v106_v1 = vld [vmem:[#allocation7 + $0x10] sm:$0xff]  ;;  %vm1008_vm1 = vcmask 1041409  }
  0x3e   :  { %v105_v2 = vld [vmem:[#allocation7 + $0x8] sm:$0xff]  ;;  %v3098_v3 = vand.u32 4294901760, %v107_v0  ;;  %v3100_v4 = vand.u32 4294901760, %v106_v1  ;;  %v104_v6 = vld [vmem:[#allocation7] sm:$0xff]  ;;  %v96_v7 = vld [vmem:[#allocation2] sm:$0xff]  ;;  %vm1010_vm2 = vcmask 1042434  }
  0x3f   :  { %v3102_v5 = vand.u32 4294901760, %v105_v2  ;;  %v97_v8 = vld [vmem:[#allocation2 + $0x8] sm:$0xff]  ;;  %v3104_v9 = vand.u32 4294901760, %v104_v6  ;;  %v110_v10 = vsel %vm108_vm0, %v96_v7, 0  ;;  %v98_v12 = vld [vmem:[#allocation2 + $0x10] sm:$0xff]  ;;  %v99_v13 = vld [vmem:[#allocation2 + $0x18] sm:$0xff] }
  0x40   :  { %v113_v11 = vsel %vm108_vm0, %v97_v8, 0  ;;  %2542 = vmatprep.subr.mxu0 %v3098_v3  ;;  %v3110_v14 = vsub.f32 %v107_v0, %v3098_v3  ;;  %v3112_v15 = vand.u32 4294901760, %v110_v10  ;;  %v3117_v17 = vsub.f32 %v106_v1, %v3100_v4  ;;  %v100_v38 = vld [vmem:[#allocation2 + $0x20] sm:$0xff]  ;;  %v101_v39 = vld [vmem:[#allocation2 + $0x28] sm:$0xff]  ;;  %v102_v47 = vld [vmem:[#allocation2 + $0x30] sm:$0xff] }
  0x41   :  { %v3114_v16 = vand.u32 4294901760, %v113_v11  ;;  %2543 = vmatpush3.msra.mxu0 %v3098_v3  ;;  %v3121_v18 = vsub.f32 %v105_v2, %v3102_v5  ;;  %v116_v19 = vsel %vm108_vm0, %v98_v12, 0  ;;  %v119_v20 = vsel %vm108_vm0, %v99_v13, 0  ;;  %v103_v48 = vld [vmem:[#allocation2 + $0x38] sm:$0xff] }
  0x42   :  { %v3126_v21 = vsub.f32 %v104_v6, %v3104_v9  ;;  %2544 = vmatprep.subr.mxu0 %v3100_v4  ;;  %v3130_v22 = vand.u32 4294901760, %v3110_v14  ;;  %v3133_v23 = vsub.f32 %v110_v10, %v3112_v15  ;;  %v3139_v25 = vand.u32 4294901760, %v3117_v17  ;;  %2570 = vmatprep.mubr.f32.mxu1 %v3112_v15 }
  0x43   :  { %v3136_v24 = vsub.f32 %v113_v11, %v3114_v16  ;;  %2545 = vmatpush3.msra.mxu0 %v3100_v4  ;;  %v3144_v26 = vand.u32 4294901760, %v3121_v18  ;;  %v3146_v27 = vand.u32 4294901760, %v116_v19  ;;  %v3148_v28 = vand.u32 4294901760, %v119_v20 }
  0x44   :  { %v3151_v29 = vand.u32 4294901760, %v3126_v21  ;;  %2546 = vmatprep.subr.mxu0 %v3102_v5  ;;  %v310_v30 = vsub.f32 %v3110_v14, %v3130_v22  ;;  %v204_v31 = vand.u32 4294901760, %v3133_v23  ;;  %v317_v33 = vsub.f32 %v3117_v17, %v3139_v25 }
  0x45   :  { %v214_v32 = vand.u32 4294901760, %v3136_v24  ;;  %2547 = vmatpush3.msra.mxu0 %v3102_v5  ;;  %v324_v34 = vsub.f32 %v3121_v18, %v3144_v26  ;;  %v3164_v35 = vsub.f32 %v116_v19, %v3146_v27  ;;  %v3167_v36 = vsub.f32 %v119_v20, %v3148_v28 }
  0x46   :  { %v331_v37 = vsub.f32 %v3126_v21, %v3151_v29  ;;  %2548 = vmatprep.subr.mxu0 %v3104_v9  ;;  %v311_v40 = vand.u32 4294901760, %v310_v30  ;;  %v205_v41 = vsub.f32 %v3133_v23, %v204_v31  ;;  %v318_v43 = vand.u32 4294901760, %v317_v33 }
  0x47   :  { %v215_v42 = vsub.f32 %v3136_v24, %v214_v32  ;;  %2549 = vmatpush3.msra.mxu0 %v3104_v9  ;;  %v325_v44 = vand.u32 4294901760, %v324_v34  ;;  %v224_v45 = vand.u32 4294901760, %v3164_v35  ;;  %v234_v46 = vand.u32 4294901760, %v3167_v36 }
  0x48   :  { %2562 = vmatprep.subr.mxu1 %v311_v40  ;;  %v206_v49 = vand.u32 4294901760, %v205_v41  ;;  %2582 = vmatprep.subr.mxu0 %v3110_v14  ;;  %v122_v51 = vsel %vm108_vm0, %v100_v38, 0  ;;  %v125_v52 = vsel %vm108_vm0, %v101_v39, 0  ;;  %v332_v57 = vand.u32 4294901760, %v331_v37 }
  0x49   :  { %v216_v50 = vand.u32 4294901760, %v215_v42  ;;  %2563 = vmatpush3.msra.mxu1 %v311_v40  ;;  %v225_v53 = vsub.f32 %v3164_v35, %v224_v45  ;;  %v235_v54 = vsub.f32 %v3167_v36, %v234_v46  ;;  %v3190_v55 = vand.u32 4294901760, %v122_v51 }
  0x4a   :  { %v3192_v56 = vand.u32 4294901760, %v125_v52  ;;  %2550 = vmatprep.mubr.f32.mxu0 %v206_v49  ;;  %2564 = vmatprep.subr.mxu1 %v318_v43  ;;  %v128_v58 = vsel %vm108_vm0, %v102_v47, 0  ;;  %v131_v59 = vsel %vm108_vm0, %v103_v48, 0  ;;  %vm1012_vm3 = vcmask 1043459  }
  0x4b   :  { %2551 = vmatmul.mubr.f32.vlgmr.msra.gmra.mxu0 %v216_v50  ;;  %2565 = vmatpush3.msra.mxu1 %v318_v43  ;;  %v226_v60 = vand.u32 4294901760, %v225_v53  ;;  %v236_v61 = vand.u32 4294901760, %v235_v54  ;;  %v3197_v62 = vsub.f32 %v122_v51, %v3190_v55  ;;  %v3203_v0 = vand.u32 4294901760, %v128_v58 }
  0x4c   :  { %v3200_v63 = vsub.f32 %v125_v52, %v3192_v56  ;;  %2566 = vmatprep.subr.mxu1 %v325_v44  ;;  %2583 = vmatpush3.msra.mxu0 %v3110_v14  ;;  %v3205_v1 = vand.u32 4294901760, %v131_v59  ;;  %vm1014_vm4 = vcmask 1044484   ;;  %vm1016_vm5 = vcmask 1045509  }
  0x4d   :  { %2553 = vmatprep.mubr.f32.mxu0 %v226_v60  ;;  %2567 = vmatpush3.msra.mxu1 %v325_v44  ;;  %v244_v2 = vand.u32 4294901760, %v3197_v62  ;;  %v3211_v7 = vsub.f32 %v128_v58, %v3203_v0  ;;  %vm1018_vm6 = vcmask 1046534   ;;  %vm1020_vm7 = vcmask 1047559  }
  0x4e   :  { %v254_v6 = vand.u32 4294901760, %v3200_v63  ;;  %2568 = vmatprep.subr.mxu1 %v332_v57  ;;  %2584 = vmatprep.subr.mxu0 %v3117_v17  ;;  %v3214_v8 = vsub.f32 %v131_v59, %v3205_v1  ;;  %vm1023_vm8 = vcmask 64512   ;;  %vm3023_vm9 = vmmov 0  }
  0x4f   :  { %2554 = vmatmul.mubr.f32.gmra.mxu0 %v236_v61  ;;  %2569 = vmatpush3.msra.mxu1 %v332_v57  ;;  %v245_v10 = vsub.f32 %v3197_v62, %v244_v2  ;;  %v264_v12 = vand.u32 4294901760, %v3211_v7 }
  0x50   :  { %v255_v11 = vsub.f32 %v3200_v63, %v254_v6  ;;  %2571 = vmatmul.mubr.f32.vlgmr.msra.gmra.mxu1 %v3114_v16  ;;  %2602 = vmatprep.subr.mxu1 %v3098_v3  ;;  %v274_v13 = vand.u32 4294901760, %v3214_v8 }
  0x51   :  { %v246_v14 = vand.u32 4294901760, %v245_v10  ;;  %2603 = vmatpush3.msra.mxu1 %v3098_v3  ;;  %2573 = vmatprep.mubr.f32.mxu1 %v3146_v27  ;;  %v265_v20 = vsub.f32 %v3211_v7, %v264_v12 }
  0x52   :  { %v256_v19 = vand.u32 4294901760, %v255_v11  ;;  %2585 = vmatpush3.msra.mxu0 %v3117_v17  ;;  %2604 = vmatprep.subr.mxu1 %v3100_v4  ;;  %v275_v30 = vsub.f32 %v3214_v8, %v274_v13 }
  0x53   :  { %2556 = vmatprep.mubr.f32.mxu0 %v246_v14  ;;  %2605 = vmatpush3.msra.mxu1 %v3100_v4  ;;  %v266_v33 = vand.u32 4294901760, %v265_v20 }
  0x54   :  { %2557 = vmatmul.mubr.f32.gmra.mxu0 %v256_v19  ;;  %2574 = vmatmul.mubr.f32.gmra.mxu1 %v3148_v28  ;;  %v276_v34 = vand.u32 4294901760, %v275_v30 }
  0x55   :  { %2586 = vmatprep.subr.mxu0 %v3121_v18  ;;  %2576 = vmatprep.mubr.f32.mxu1 %v3190_v55 }
  0x56   :  { %2559 = vmatprep.mubr.f32.mxu0 %v266_v33  ;;  %2587 = vmatpush3.msra.mxu0 %v3121_v18 }
  0x57   :  { %2588 = vmatprep.subr.mxu0 %v3126_v21  ;;  %2606 = vmatprep.subr.mxu1 %v3102_v5 }
  0x58   :  { %2560 = vmatmul.mubr.f32.gmra.mxu0 %v276_v34  ;;  %2577 = vmatmul.mubr.f32.gmra.mxu1 %v3192_v56 }
  0x59   :  { %2589 = vmatpush3.msra.mxu0 %v3126_v21  ;;  %2590 = vmatprep.mubr.f32.mxu0 %v3133_v23 }
  0x5a   :  { %2607 = vmatpush3.msra.mxu1 %v3102_v5  ;;  %2579 = vmatprep.mubr.f32.mxu1 %v3203_v0 }
  0x5b   :  { %2608 = vmatprep.subr.mxu1 %v3104_v9  ;;  %2622 = vmatprep.subr.mxu0 %v3130_v22 }
  0x5c   :  { %2591 = vmatmul.mubr.f32.vlgmr.msra.gmra.mxu0 %v3136_v24  ;;  %2580 = vmatmul.mubr.f32.gmra.mxu1 %v3205_v1 }
  0x5d   :  { %2593 = vmatprep.mubr.f32.mxu0 %v3164_v35  ;;  %2609 = vmatpush3.msra.mxu1 %v3104_v9 }
  0x5e   :  { %2610 = vmatprep.mubr.f32.mxu1 %v204_v31  ;;  %2623 = vmatpush3.msra.mxu0 %v3130_v22 }
  0x5f   :  { %2642 = vmatprep.subr.mxu1 %v3098_v3  ;;  %2624 = vmatprep.subr.mxu0 %v3139_v25 }
  0x60   :  { %2594 = vmatmul.mubr.f32.gmra.mxu0 %v3167_v36  ;;  %2611 = vmatmul.mubr.f32.vlgmr.msra.gmra.mxu1 %v214_v32 }
  0x61   :  { %2596 = vmatprep.mubr.f32.mxu0 %v3197_v62  ;;  %2643 = vmatpush3.msra.mxu1 %v3098_v3 }
  0x62   :  { %2613 = vmatprep.mubr.f32.mxu1 %v224_v45  ;;  %2625 = vmatpush3.msra.mxu0 %v3139_v25 }
  0x63   :  { %2644 = vmatprep.subr.mxu1 %v3100_v4  ;;  %2626 = vmatprep.subr.mxu0 %v3144_v26 }
  0x64   :  { %2597 = vmatmul.mubr.f32.gmra.mxu0 %v3200_v63  ;;  %2614 = vmatmul.mubr.f32.gmra.mxu1 %v234_v46 }
  0x65   :  { %2599 = vmatprep.mubr.f32.mxu0 %v3211_v7  ;;  %2645 = vmatpush3.msra.mxu1 %v3100_v4 }
  0x66   :  { %2616 = vmatprep.mubr.f32.mxu1 %v244_v2  ;;  %2627 = vmatpush3.msra.mxu0 %v3144_v26 }
  0x67   :  { %2628 = vmatprep.subr.mxu0 %v3151_v29  ;;  %2646 = vmatprep.subr.mxu1 %v3102_v5 }
  0x68   :  { %2600 = vmatmul.mubr.f32.gmra.mxu0 %v3214_v8  ;;  %2617 = vmatmul.mubr.f32.gmra.mxu1 %v254_v6 }
  0x69   :  { %2629 = vmatpush3.msra.mxu0 %v3151_v29  ;;  %2630 = vmatprep.mubr.f32.mxu0 %v3112_v15 }
  0x6a   :  { %2647 = vmatpush3.msra.mxu1 %v3102_v5  ;;  %2619 = vmatprep.mubr.f32.mxu1 %v264_v12 }
  0x6b   :  { %2648 = vmatprep.subr.mxu1 %v3104_v9 }
  0x6c   :  { %2631 = vmatmul.mubr.f32.vlgmr.msra.gmra.mxu0 %v3114_v16  ;;  %2620 = vmatmul.mubr.f32.gmra.mxu1 %v274_v13 }
  0x6d   :  { %2633 = vmatprep.mubr.f32.mxu0 %v3146_v27  ;;  %2649 = vmatpush3.msra.mxu1 %v3104_v9 }
  0x6e   :  { %2650 = vmatprep.mubr.f32.mxu1 %v3112_v15 }
  0x70   :  { %2634 = vmatmul.mubr.f32.gmra.mxu0 %v3148_v28  ;;  %2651 = vmatmul.mubr.f32.vlgmr.msra.gmra.mxu1 %v3114_v16 }
  0x71   :  { %2636 = vmatprep.mubr.f32.mxu0 %v3190_v55  ;;  %2653 = vmatprep.mubr.f32.mxu1 %v3146_v27 }
  0x74   :  { %2637 = vmatmul.mubr.f32.gmra.mxu0 %v3192_v56  ;;  %2654 = vmatmul.mubr.f32.gmra.mxu1 %v3148_v28 }
  0x75   :  { %2639 = vmatprep.mubr.f32.mxu0 %v3203_v0  ;;  %2656 = vmatprep.mubr.f32.mxu1 %v3190_v55 }
  0x78   :  { %2640 = vmatmul.mubr.f32.gmra.mxu0 %v3205_v1  ;;  %2657 = vmatmul.mubr.f32.gmra.mxu1 %v3192_v56 }
  0x79   :  { %2659 = vmatprep.mubr.f32.mxu1 %v3203_v0 }
  0x7c   :  { %2660 = vmatmul.mubr.f32.gmra.mxu1 %v3205_v1 }
 0x10b   :  { %v2552_v3 = vpop.f32.mrf.mxu0 }
 0x10d   :  { %v208_v4 = vpop.f32.mrf.mxu0 }
 0x10f   :  { %v2555_v5 = vpop.f32.mrf.mxu0 }
 0x110   :  { %v2572_v9 = vpop.f32.mrf.mxu1 }
 0x111   :  { %v228_v15 = vpop.f32.mrf.mxu0  ;;  %v376_v44 = vadd.f32 %v2572_v9, %v2552_v3 }
 0x112   :  { %v369_v16 = vpop.f32.mrf.mxu1 }
 0x113   :  { %v370_v47 = vadd.f32 %v369_v16, %v208_v4 }
 0x114   :  { %v2558_v17 = vpop.f32.mrf.mxu0  ;;  %v2575_v18 = vpop.f32.mrf.mxu1 }
 0x115   :  { %v388_v51 = vadd.f32 %v2575_v18, %v2555_v5 }
 0x116   :  { %v248_v21 = vpop.f32.mrf.mxu0  ;;  %v381_v22 = vpop.f32.mrf.mxu1 }
 0x117   :  { %v382_v56 = vadd.f32 %v381_v22, %v228_v15 }
 0x118   :  { %v2561_v23 = vpop.f32.mrf.mxu0  ;;  %v2578_v24 = vpop.f32.mrf.mxu1 }
 0x119   :  { %v400_v60 = vadd.f32 %v2578_v24, %v2558_v17 }
 0x11a   :  { %v268_v25 = vpop.f32.mrf.mxu0  ;;  %v393_v26 = vpop.f32.mrf.mxu1 }
 0x11b   :  { %v394_v6 = vadd.f32 %v393_v26, %v248_v21 }
 0x11c   :  { %v2592_v27 = vpop.f32.mrf.mxu0  ;;  %v2581_v28 = vpop.f32.mrf.mxu1 }
 0x11d   :  { %v499_v48 = vadd.f32 %v2592_v27, %v376_v44  ;;  %v412_v14 = vadd.f32 %v2581_v28, %v2561_v23 }
 0x11e   :  { %v491_v29 = vpop.f32.mrf.mxu0  ;;  %v405_v31 = vpop.f32.mrf.mxu1 }
 0x11f   :  { %v492_v52 = vadd.f32 %v491_v29, %v370_v47  ;;  %v406_v4 = vadd.f32 %v405_v31, %v268_v25 }
 0x120   :  { %v2595_v32 = vpop.f32.mrf.mxu0  ;;  %v2612_v35 = vpop.f32.mrf.mxu1 }
 0x121   :  { %v626_v53 = vadd.f32 %v2612_v35, %v499_v48  ;;  %v513_v57 = vadd.f32 %v2595_v32, %v388_v51 }
 0x122   :  { %v505_v36 = vpop.f32.mrf.mxu0  ;;  %v617_v37 = vpop.f32.mrf.mxu1 }
 0x123   :  { %v618_v58 = vadd.f32 %v617_v37, %v492_v52  ;;  %v506_v63 = vadd.f32 %v505_v36, %v382_v56 }
 0x124   :  { %v2598_v38 = vpop.f32.mrf.mxu0  ;;  %v2615_v39 = vpop.f32.mrf.mxu1 }
 0x125   :  { %v642_v0 = vadd.f32 %v2615_v39, %v513_v57  ;;  %v527_v7 = vadd.f32 %v2598_v38, %v400_v60  ;;  %v2408_v39 = vld [vmem:[%s3654_s3] ss:$0 sm:$0xff]  ;;  %s3024_s3 = smov [#allocation12]  }
 0x126   :  { %v519_v40 = vpop.f32.mrf.mxu0  ;;  %v633_v41 = vpop.f32.mrf.mxu1  ;;  %s2393_s29 = sshll.u32 %s3024_s3, 4  ;;  %s2394_s29 = int_to_ptr.vmem [resolvable:$true] %s2393_s29 }
 0x127   :  { %v634_v11 = vadd.f32 %v633_v41, %v506_v63  ;;  %v520_v19 = vadd.f32 %v519_v40, %v394_v6  ;;  %s2964_s30 = scalar_lea.vmem %s2394_s29, 128  ;;  %p2969_p12 = scmp.lt.s32.totalorder %s2394_s29, %s2394_s29 }
 0x128   :  { %v2601_v42 = vpop.f32.mrf.mxu0  ;;  %v2618_v43 = vpop.f32.mrf.mxu1  ;;  %p2965_p11 = scmp.ne.s32.totalorder %s2394_s29, %s2964_s30  ;;  %p2970_p13 = scmp.lt.s32.totalorder %s2964_s30, %s2964_s30 }
 0x129   :  { %v658_v33 = vadd.f32 %v2618_v43, %v527_v7  ;;  %v541_v5 = vadd.f32 %v2601_v42, %v412_v14 }
 0x12a   :  { %v533_v45 = vpop.f32.mrf.mxu0  ;;  %v649_v46 = vpop.f32.mrf.mxu1  ;;  %p2971_p0 = por %p2970_p13, %p2969_p12 }
 0x12b   :  { %v650_v16 = vadd.f32 %v649_v46, %v520_v19  ;;  %v534_v21 = vadd.f32 %v533_v45, %v406_v4 }
 0x12c   :  { %v2632_v49 = vpop.f32.mrf.mxu0  ;;  %v2621_v50 = vpop.f32.mrf.mxu1  ;;  %p2972_p1 = pnand %p2971_p0, %p2965_p11 }
 0x12d   :  { %v763_v59 = vadd.f32 %v2632_v49, %v626_v53  ;;  %v674_v26 = vadd.f32 %v2621_v50, %v541_v5 }
 0x12e   :  { %v756_v54 = vpop.f32.mrf.mxu0  ;;  %v665_v55 = vpop.f32.mrf.mxu1 }
 0x12f   :  { %v757_v1 = vadd.f32 %v756_v54, %v618_v58  ;;  %v666_v32 = vadd.f32 %v665_v55, %v534_v21 }
 0x130   :  { %v2635_v61 = vpop.f32.mrf.mxu0  ;;  %v2652_v62 = vpop.f32.mrf.mxu1 }
 0x131   :  { %v880_v2 = vadd.f32 %v2652_v62, %v763_v59  ;;  %v775_v12 = vadd.f32 %v2635_v61, %v642_v0 }
 0x132   :  { %v768_v8 = vpop.f32.mrf.mxu0  ;;  %v873_v10 = vpop.f32.mrf.mxu1 }
 0x133   :  { %2808 = vtanh.f32 %v880_v2  ;;  %v874_v13 = vadd.f32 %v873_v10, %v757_v1  ;;  %v769_v34 = vadd.f32 %v768_v8, %v634_v11  ;;  %v974_v1 = vlaneseq }
 0x134   :  { %v2638_v20 = vpop.f32.mrf.mxu0  ;;  %v2655_v30 = vpop.f32.mrf.mxu1 }
 0x135   :  { %2810 = vtanh.f32 %v874_v13  ;;  %v892_v3 = vadd.f32 %v2655_v30, %v775_v12  ;;  %v787_v17 = vadd.f32 %v2638_v20, %v658_v33  ;;  %v975_v2 = vand.u32 127, %v974_v1 }
 0x136   :  { %v780_v9 = vpop.f32.mrf.mxu0  ;;  %v885_v15 = vpop.f32.mrf.mxu1  ;;  %v3305_v6 = vshrl.u32 %v974_v1, 7 }
 0x137   :  { %2812 = vtanh.f32 %v892_v3  ;;  %v886_v18 = vadd.f32 %v885_v15, %v769_v34  ;;  %v781_v23 = vadd.f32 %v780_v9, %v650_v16 }
 0x138   :  { %v2641_v22 = vpop.f32.mrf.mxu0  ;;  %v2658_v24 = vpop.f32.mrf.mxu1  ;;  %v3308_v8 = vsub.s32 %v975_v2, %v3305_v6 }
 0x139   :  { %2814 = vtanh.f32 %v886_v18  ;;  %v904_v27 = vadd.f32 %v2658_v24, %v787_v17  ;;  %v799_v35 = vadd.f32 %v2641_v22, %v674_v26 }
 0x13a   :  { %v792_v28 = vpop.f32.mrf.mxu0  ;;  %v897_v29 = vpop.f32.mrf.mxu1 }
 0x13b   :  { %2816 = vtanh.f32 %v904_v27  ;;  %v898_v25 = vadd.f32 %v897_v29, %v781_v23  ;;  %v793_v36 = vadd.f32 %v792_v28, %v666_v32  ;;  %v3021_v27 = vmov 0  }
 0x13c   :  { %v2661_v31 = vpop.f32.mrf.mxu1  ;;  %2807 = vset.pattern.permute.xlu0 %v3021_v27  ;;  %2806 = vset.pattern.permute.xlu1 %v3021_v27  ;;  %v1030_v28 = vsub.s32 0, %v3305_v6  ;;  %v1034_v29 = vsub.s32 1, %v3305_v6  ;;  %v1038_v32 = vsub.s32 2, %v3305_v6 }
 0x13d   :  { %2818 = vtanh.f32 %v898_v25  ;;  %v916_v37 = vadd.f32 %v2661_v31, %v799_v35  ;;  %v1042_v35 = vsub.s32 3, %v3305_v6 }
 0x13e   :  { %v909_v38 = vpop.f32.mrf.mxu1 }
 0x13f   :  { %2820 = vtanh.f32 %v916_v37  ;;  %v910_v40 = vadd.f32 %v909_v38, %v793_v36  ;;  %v1046_v38 = vsub.s32 4, %v3305_v6 }
 0x140   :  { %v2809_v41 = vpop.eup %2808 }
 0x141   :  { %2822 = vtanh.f32 %v910_v40  ;;  %v935_v42 = vmul.f32 %v2809_v41, %v2408_v39 }
 0x142   :  { %v2811_v43 = vpop.eup %2810 }
 0x143   :  { %v945_v44 = vsel %vm108_vm0, %v935_v42, 0.0  ;;  %v934_v45 = vmul.f32 %v2811_v43, %v2408_v39 }
 0x144   :  { %v2813_v46 = vpop.eup %2812  ;;  %946 = vadd.xlane.f32.xlu0 %v945_v44 }
 0x145   :  { %v937_v47 = vmul.f32 %v2813_v46, %v2408_v39  ;;  %v942_v50 = vsel %vm108_vm0, %v934_v45, 0.0  ;;  %v1050_v45 = vsub.s32 5, %v3305_v6 }
 0x146   :  { %v2815_v48 = vpop.eup %2814 }
 0x147   :  { %v951_v49 = vsel %vm108_vm0, %v937_v47, 0.0  ;;  %v936_v51 = vmul.f32 %v2815_v48, %v2408_v39 }
 0x148   :  { %v2817_v52 = vpop.eup %2816  ;;  %952 = vadd.xlane.f32.xlu1 %v951_v49  ;;  %943 = vadd.xlane.f32.xlu0 %v942_v50  ;;  %v1054_v49 = vsub.s32 6, %v3305_v6 }
 0x149   :  { %v948_v54 = vsel %vm108_vm0, %v936_v51, 0.0  ;;  %v939_v56 = vmul.f32 %v2817_v52, %v2408_v39 }
 0x14a   :  { %v2819_v53 = vpop.eup %2818 }
 0x14b   :  { %v938_v55 = vmul.f32 %v2819_v53, %v2408_v39  ;;  %v957_v60 = vsel %vm108_vm0, %v939_v56, 0.0  ;;  %v1058_v53 = vsub.s32 7, %v3305_v6  ;;  %v1375_v6 = vld [vmem:[#allocation10 + $0x8] sm:$0xff] }
 0x14c   :  { %v2821_v57 = vpop.eup %2820  ;;  %949 = vadd.xlane.f32.xlu1 %v948_v54 }
 0x14d   :  { %v954_v58 = vsel %vm108_vm0, %v938_v55, 0.0  ;;  %v941_v62 = vmul.f32 %v2821_v57, %v2408_v39 }
 0x14e   :  { %v2823_v59 = vpop.eup %2822  ;;  %955 = vadd.xlane.f32.xlu0 %v954_v58 }
 0x14f   :  { %v940_v61 = vmul.f32 %v2823_v59, %v2408_v39  ;;  %v963_v0 = vsel %vm108_vm0, %v941_v62, 0.0 }
 0x150   :  { %958 = vadd.xlane.f32.xlu1 %v957_v60 }
 0x151   :  { %v960_v63 = vsel %vm108_vm0, %v940_v61, 0.0 }
 0x152   :  { %961 = vadd.xlane.f32.xlu0 %v960_v63 }
 0x154   :  { %964 = vadd.xlane.f32.xlu1 %v963_v0 }
 0x1cd   :  { %v947_v7 = vpop.xlane.xlu0 %946 }
 0x1ce   :  { %v983_v13 = vrot.slane %v947_v7, %v3308_v8 }
 0x1d1   :  { %v953_v10 = vpop.xlane.xlu1 %952  ;;  %v944_v11 = vpop.xlane.xlu0 %943 }
 0x1d2   :  { %v979_v12 = vrot.slane %v944_v11, %v3308_v8  ;;  %v991_v20 = vrot.slane %v953_v10, %v3308_v8 }
 0x1d4   :  { %v1009_v30 = vsel %vm1008_vm1, %v983_v13, %v979_v12 }
 0x1d5   :  { %v950_v14 = vpop.xlane.xlu1 %949 }
 0x1d6   :  { %v987_v19 = vrot.slane %v950_v14, %v3308_v8 }
 0x1d7   :  { %v956_v33 = vpop.xlane.xlu0 %955 }
 0x1d8   :  { %v1011_v34 = vsel %vm1010_vm2, %v987_v19, %v1009_v30  ;;  %v995_v3 = vrot.slane %v956_v33, %v3308_v8 }
 0x1d9   :  { %v1013_v4 = vsel %vm1012_vm3, %v991_v20, %v1011_v34  ;;  %v959_v5 = vpop.xlane.xlu1 %958 }
 0x1da   :  { %v1015_v9 = vsel %vm1014_vm4, %v995_v3, %v1013_v4  ;;  %v999_v15 = vrot.slane %v959_v5, %v3308_v8 }
 0x1db   :  { %v962_v16 = vpop.xlane.xlu0 %961 }
 0x1dc   :  { %v1003_v17 = vrot.slane %v962_v16, %v3308_v8  ;;  %v1017_v18 = vsel %vm1016_vm5, %v999_v15, %v1015_v9 }
 0x1dd   :  { %v965_v21 = vpop.xlane.xlu1 %964 }
 0x1de   :  { %v1007_v22 = vrot.slane %v965_v21, %v3308_v8  ;;  %v1019_v24 = vsel %vm1018_vm6, %v1003_v17, %v1017_v18 }
 0x1e0   :  { %v1021_v26 = vsel %vm1020_vm7, %v1007_v22, %v1019_v24 }
 0x1e1   :  { %v1024_v23 = vsel %vm1023_vm8, %v1021_v26, -inf }
 0x1e2   :  { %1025 = vmax.xlane.f32.xlu0 %v1024_v23 }
 0x26b   :  { %v1026_v25 = vpop.xlane.xlu0 %1025 }
 0x26c   :  { %v1031_v31 = vrot.slane %v1026_v25, %v1030_v28  ;;  %v1035_v36 = vrot.slane %v1026_v25, %v1034_v29  ;;  %v1039_v37 = vrot.slane %v1026_v25, %v1038_v32  ;;  %v1043_v39 = vrot.slane %v1026_v25, %v1042_v35 }
 0x26d   :  { %v1047_v46 = vrot.slane %v1026_v25, %v1046_v38  ;;  %v1051_v50 = vrot.slane %v1026_v25, %v1050_v45  ;;  %v1055_v54 = vrot.slane %v1026_v25, %v1054_v49  ;;  %v1059_v57 = vrot.slane %v1026_v25, %v1058_v53 }
 0x26e   :  { %v1068_v40 = vsub.f32 %v944_v11, %v1031_v31  ;;  %v1069_v41 = vsub.f32 %v947_v7, %v1035_v36  ;;  %v1070_v42 = vsub.f32 %v950_v14, %v1039_v37  ;;  %v1071_v47 = vsub.f32 %v953_v10, %v1043_v39 }
 0x26f   :  { %v1072_v51 = vsub.f32 %v956_v33, %v1047_v46  ;;  %v1073_v55 = vsub.f32 %v959_v5, %v1051_v50  ;;  %v1074_v58 = vsub.f32 %v962_v16, %v1055_v54  ;;  %v1075_v62 = vsub.f32 %v965_v21, %v1059_v57 }
 0x270   :  { %v1076_v43 = vmul.f32 1.442695, %v1068_v40  ;;  %v1078_v44 = vmul.f32 1.442695, %v1069_v41  ;;  %v1080_v48 = vmul.f32 1.442695, %v1070_v42 }
 0x271   :  { %v1082_v52 = vmul.f32 1.442695, %v1071_v47  ;;  %v1084_v56 = vmul.f32 1.442695, %v1072_v51  ;;  %v1086_v59 = vmul.f32 1.442695, %v1073_v55 }
 0x272   :  { %2824 = vpow2.f32 %v1076_v43  ;;  %v1088_v63 = vmul.f32 1.442695, %v1074_v58  ;;  %v1090_v1 = vmul.f32 1.442695, %v1075_v62  ;;  %v1377_v51 = vld [vmem:[#allocation10 + $0x18] sm:$0xff]  ;;  %v3417_v58 = vand.u32 4294901760, %v1375_v6 }
 0x273   :  { %2826 = vpow2.f32 %v1078_v44 }
 0x274   :  { %2828 = vpow2.f32 %v1080_v48 }
 0x275   :  { %2830 = vpow2.f32 %v1082_v52  ;;  %v1376_v52 = vld [vmem:[#allocation10 + $0x10] sm:$0xff] }
 0x276   :  { %2832 = vpow2.f32 %v1084_v56  ;;  %v3411_v56 = vand.u32 4294901760, %v1376_v52 }
 0x277   :  { %2834 = vpow2.f32 %v1086_v59 }
 0x278   :  { %2836 = vpow2.f32 %v1088_v63  ;;  %v3415_v57 = vsub.f32 %v1376_v52, %v3411_v56 }
 0x279   :  { %2838 = vpow2.f32 %v1090_v1 }
 0x27a   :  { %v1494_v63 = vand.u32 4294901760, %v3415_v57 }
 0x27f   :  { %v2825_v60 = vpop.eup %2824 }
 0x280   :  { %v3350_v61 = vpop.eup %2826  ;;  %1101 = vperm.xlu1 %2806, %v2825_v60  }
 0x281   :  { %1104 = vperm.xlu0 %2807, %v3350_v61   ;;  %v3353_v0 = vpop.eup %2828 }
 0x282   :  { %v3356_v2 = vpop.eup %2830 }
 0x283   :  { %v3359_v7 = vpop.eup %2832 }
 0x284   :  { %1107 = vperm.xlu1 %2806, %v3353_v0   ;;  %v3362_v10 = vpop.eup %2834 }
 0x285   :  { %v3365_v11 = vpop.eup %2836 }
 0x286   :  { %v3368_v12 = vpop.eup %2838 }
 0x288   :  { %1110 = vperm.xlu1 %2806, %v3356_v2  }
 0x28c   :  { %1113 = vperm.xlu1 %2806, %v3359_v7  }
 0x290   :  { %1116 = vperm.xlu1 %2806, %v3362_v10  }
 0x294   :  { %1119 = vperm.xlu1 %2806, %v3365_v11  }
 0x298   :  { %1122 = vperm.xlu1 %2806, %v3368_v12  }
 0x2fb   :  { %v1102_v13 = vpop.permute.xlu1 %1101 }
 0x2fc   :  { %v1105_v30 = vpop.permute.xlu0 %1104  ;;  %v1127_v3 = vrot.slane %v1102_v13, %v3308_v8 }
 0x2fd   :  { %v1131_v34 = vrot.slane %v1105_v30, %v3308_v8 }
 0x2ff   :  { %v1108_v14 = vpop.permute.xlu1 %1107  ;;  %v1156_v16 = vsel %vm1008_vm1, %v1131_v34, %v1127_v3 }
 0x300   :  { %v1135_v4 = vrot.slane %v1108_v14, %v3308_v8  ;;  %v3022_v14 = vmov 0.0  }
 0x301   :  { %2662 = vmatprep.subr.mxu0 %v3022_v14  ;;  %2673 = vmatprep.subr.mxu1 %v3022_v14 }
 0x302   :  { %v1157_v18 = vsel %vm1010_vm2, %v1135_v4, %v1156_v16  ;;  %2670 = vmatprep.mubr.msk.f32.mxu0 %vm3023_vm9, %v3022_v14  ;;  %2681 = vmatprep.mubr.msk.f32.mxu1 %vm3023_vm9, %v3022_v14 }
 0x303   :  { %v1111_v19 = vpop.permute.xlu1 %1110 }
 0x304   :  { %v1139_v5 = vrot.slane %v1111_v19, %v3308_v8  ;;  %v1495_v19 = vsub.f32 %v3415_v57, %v1494_v63 }
 0x306   :  { %v1158_v22 = vsel %vm1012_vm3, %v1139_v5, %v1157_v18  ;;  %v1496_v3 = vand.u32 4294901760, %v1495_v19 }
 0x307   :  { %v1114_v20 = vpop.permute.xlu1 %1113 }
 0x308   :  { %v1143_v9 = vrot.slane %v1114_v20, %v3308_v8 }
 0x30a   :  { %v1159_v24 = vsel %vm1014_vm4, %v1143_v9, %v1158_v22 }
 0x30b   :  { %v1117_v33 = vpop.permute.xlu1 %1116 }
 0x30c   :  { %v1147_v17 = vrot.slane %v1117_v33, %v3308_v8 }
 0x30e   :  { %v1160_v23 = vsel %vm1016_vm5, %v1147_v17, %v1159_v24 }
 0x30f   :  { %v1120_v15 = vpop.permute.xlu1 %1119 }
 0x310   :  { %v1151_v21 = vrot.slane %v1120_v15, %v3308_v8 }
 0x312   :  { %v1161_v25 = vsel %vm1018_vm6, %v1151_v21, %v1160_v23 }
 0x313   :  { %v1123_v26 = vpop.permute.xlu1 %1122 }
 0x314   :  { %v1155_v27 = vrot.slane %v1123_v26, %v3308_v8 }
 0x316   :  { %v1162_v31 = vsel %vm1020_vm7, %v1155_v27, %v1161_v25  ;;  %v1371_v27 = vld [vmem:[#allocation8 + $0x10] sm:$0xff] }
 0x317   :  { %v1164_v36 = vsel %vm1023_vm8, %v1162_v31, 0.0  ;;  %v3486_v31 = vand.u32 4294901760, %v1371_v27 }
 0x318   :  { %1165 = vadd.xlane.f32.xlu1 %v1164_v36  ;;  %v1370_v36 = vld [vmem:[#allocation8 + $0x8] sm:$0xff] }
 0x3a1   :  { %v1166_v37 = vpop.xlane.xlu1 %1165 }
 0x3a2   :  { %v1171_v39 = vrot.slane %v1166_v37, %v1030_v28  ;;  %v1175_v40 = vrot.slane %v1166_v37, %v1034_v29  ;;  %v1179_v41 = vrot.slane %v1166_v37, %v1038_v32  ;;  %v1183_v42 = vrot.slane %v1166_v37, %v1042_v35 }
 0x3a3   :  { %v1187_v43 = vrot.slane %v1166_v37, %v1046_v38  ;;  %v1191_v28 = vrot.slane %v1166_v37, %v1050_v45  ;;  %v1195_v32 = vrot.slane %v1166_v37, %v1054_v49  ;;  %v1199_v38 = vrot.slane %v1166_v37, %v1058_v53 }
 0x3a4   :  { %2840 = vrcp.f32 %v1171_v39  ;;  %v3405_v45 = vand.u32 4294901760, %v1377_v51  ;;  %v3495_v37 = vsub.f32 %v1371_v27, %v3486_v31  ;;  %v3497_v39 = vand.u32 4294901760, %v1370_v36 }
 0x3a5   :  { %2842 = vrcp.f32 %v1175_v40 }
 0x3a6   :  { %2844 = vrcp.f32 %v1179_v41  ;;  %v3409_v55 = vsub.f32 %v1377_v51, %v3405_v45  ;;  %2663 = vmatpush3.msra.mxu0 %v3405_v45  ;;  %v1369_v41 = vld [vmem:[#allocation8] sm:$0xff] }
 0x3a7   :  { %2846 = vrcp.f32 %v1183_v42  ;;  %2664 = vmatprep.subr.mxu0 %v3022_v14  ;;  %v3503_v42 = vsub.f32 %v1370_v36, %v3497_v39 }
 0x3a8   :  { %2848 = vrcp.f32 %v1187_v43  ;;  %v1487_v53 = vand.u32 4294901760, %v3409_v55  ;;  %2665 = vmatpush3.msra.mxu0 %v3411_v56  ;;  %v3505_v43 = vand.u32 4294901760, %v1369_v41 }
 0x3a9   :  { %2850 = vrcp.f32 %v1191_v28  ;;  %2666 = vmatprep.subr.mxu0 %v3022_v14 }
 0x3aa   :  { %2852 = vrcp.f32 %v1195_v32  ;;  %v1488_v62 = vsub.f32 %v3409_v55, %v1487_v53  ;;  %2667 = vmatpush3.msra.mxu0 %v3417_v58  ;;  %v3514_v28 = vsub.f32 %v1369_v41, %v3505_v43 }
 0x3ab   :  { %2854 = vrcp.f32 %v1199_v38  ;;  %2668 = vmatprep.subr.mxu0 %v3022_v14 }
 0x3b1   :  { %v2841_v44 = vpop.eup %2840 }
 0x3b2   :  { %v1209_v46 = vmul.f32 %v2841_v44, %v2825_v60  ;;  %v2843_v29 = vpop.eup %2842  ;;  %v1374_v60 = vld [vmem:[#allocation10] sm:$0xff]  ;;  %v1996_v44 = vand.u32 4294901760, %v3495_v37 }
 0x3b3   :  { %v1211_v47 = vmul.f32 %v2843_v29, %v3350_v61  ;;  %v2845_v35 = vpop.eup %2844  ;;  %v1373_v61 = vld [vmem:[#allocation5] sm:$0xff]  ;;  %v3427_v1 = vand.u32 4294901760, %v1374_v60  ;;  %v2003_v29 = vand.u32 4294901760, %v3503_v42 }
 0x3b4   :  { %1233 = vperm.xlu0 %2807, %v1209_v46   ;;  %v1213_v48 = vmul.f32 %v2845_v35, %v3353_v0  ;;  %v2847_v50 = vpop.eup %2846  ;;  %v3425_v0 = vsub.f32 %v1375_v6, %v3417_v58  ;;  %v1379_v13 = vsel %vm108_vm0, %v1373_v61, 0  ;;  %v1997_v32 = vsub.f32 %v3495_v37, %v1996_v44 }
 0x3b5   :  { %v2849_v54 = vpop.eup %2848  ;;  %v1215_v49 = vmul.f32 %v2847_v50, %v3356_v2  ;;  %v3436_v30 = vsub.f32 %v1374_v60, %v3427_v1  ;;  %v3440_v33 = vand.u32 4294901760, %v1379_v13  ;;  %2669 = vmatpush3.msra.mxu0 %v3427_v1  ;;  %v2004_v38 = vsub.f32 %v3503_v42, %v2003_v29 }
 0x3b6   :  { %v1217_v59 = vmul.f32 %v2849_v54, %v3359_v7  ;;  %v2851_v2 = vpop.eup %2850  ;;  %v1489_v7 = vand.u32 4294901760, %v1488_v62  ;;  %v1501_v20 = vand.u32 4294901760, %v3425_v0  ;;  %2684 = vmatprep.subr.mxu0 %v3022_v14 }
 0x3b7   :  { %v1219_v34 = vmul.f32 %v2851_v2, %v3362_v10  ;;  %v1508_v5 = vand.u32 4294901760, %v3436_v30  ;;  %v2853_v9 = vpop.eup %2852  ;;  %v1451_v15 = vsub.f32 %v1379_v13, %v3440_v33  ;;  %v2005_v51 = vand.u32 4294901760, %v2004_v38 }
 0x3b8   :  { %1236 = vperm.xlu0 %2807, %v1211_v47   ;;  %2674 = vmatpush3.msra.mxu1 %v1489_v7  ;;  %v1502_v4 = vsub.f32 %v3425_v0, %v1501_v20  ;;  %v1221_v18 = vmul.f32 %v2853_v9, %v3365_v11  ;;  %v2855_v22 = vpop.eup %2854  ;;  %v2010_v47 = vand.u32 4294901760, %v3514_v28 }
 0x3b9   :  { %2675 = vmatprep.subr.mxu1 %v3022_v14  ;;  %v1509_v16 = vsub.f32 %v3436_v30, %v1508_v5  ;;  %v1452_v17 = vand.u32 4294901760, %v1451_v15  ;;  %v1223_v11 = vmul.f32 %v2855_v22, %v3368_v12  ;;  %v1372_v12 = vld [vmem:[#allocation8 + $0x18] sm:$0xff] }
 0x3ba   :  { %2676 = vmatpush3.msra.mxu1 %v1496_v3  ;;  %v1503_v10 = vand.u32 4294901760, %v1502_v4  ;;  %v3477_v23 = vand.u32 4294901760, %v1372_v12  ;;  %v2011_v50 = vsub.f32 %v3514_v28, %v2010_v47 }
 0x3bb   :  { %2677 = vmatprep.subr.mxu1 %v3022_v14  ;;  %v1510_v21 = vand.u32 4294901760, %v1509_v16  ;;  %v1453_v24 = vsub.f32 %v1451_v15, %v1452_v17 }
 0x3bc   :  { %1239 = vperm.xlu0 %2807, %v1213_v48   ;;  %2678 = vmatpush3.msra.mxu1 %v1503_v10  ;;  %v3484_v25 = vsub.f32 %v1372_v12, %v3477_v23  ;;  %v1998_v48 = vand.u32 4294901760, %v1997_v32 }
 0x3bd   :  { %2679 = vmatprep.subr.mxu1 %v3022_v14  ;;  %v1454_v26 = vand.u32 4294901760, %v1453_v24 }
 0x3be   :  { %2680 = vmatpush3.msra.mxu1 %v1510_v21  ;;  %v1989_v40 = vand.u32 4294901760, %v3484_v25 }
 0x3bf   :  { %2695 = vmatprep.subr.mxu1 %v3022_v14  ;;  %2671 = vmatmul.mubr.f32.vlgmr.msra.gmra.mxu0 %v1454_v26 }
 0x3c0   :  { %1242 = vperm.xlu0 %2807, %v1215_v49   ;;  %2682 = vmatmul.mubr.f32.vlgmr.msra.gmra.mxu1 %v3440_v33  ;;  %v1990_v46 = vsub.f32 %v3484_v25, %v1989_v40  ;;  %v2856_v49 = vld [vmem:[#allocation2 + $0x8] sm:$0xff] }
 0x3c1   :  { %2685 = vmatpush3.msra.mxu0 %v3409_v55  ;;  %2696 = vmatpush3.msra.mxu1 %v3405_v45 }
 0x3c2   :  { %2686 = vmatprep.subr.mxu0 %v3022_v14  ;;  %2697 = vmatprep.subr.mxu1 %v3022_v14  ;;  %v1991_v35 = vand.u32 4294901760, %v1990_v46 }
 0x3c3   :  { %2687 = vmatpush3.msra.mxu0 %v3415_v57  ;;  %2698 = vmatpush3.msra.mxu1 %v3411_v56  ;;  %v2858_v57 = vld [vmem:[#allocation2 + $0x10] sm:$0xff] }
 0x3c4   :  { %1245 = vperm.xlu0 %2807, %v1217_v59   ;;  %2688 = vmatprep.subr.mxu0 %v3022_v14 }
 0x3c5   :  { %2699 = vmatprep.subr.mxu1 %v3022_v14  ;;  %2689 = vmatpush3.msra.mxu0 %v3425_v0 }
 0x3c6   :  { %2700 = vmatpush3.msra.mxu1 %v3417_v58  ;;  %2690 = vmatprep.subr.mxu0 %v3022_v14 }
 0x3c7   :  { %2701 = vmatprep.subr.mxu1 %v3022_v14  ;;  %2691 = vmatpush3.msra.mxu0 %v3436_v30  ;;  %v2860_v30 = vld [vmem:[#allocation2 + $0x20] sm:$0xff] }
 0x3c8   :  { %1248 = vperm.xlu0 %2807, %v1219_v34   ;;  %2702 = vmatpush3.msra.mxu1 %v3427_v1 }
 0x3c9   :  { %2692 = vmatprep.mubr.msk.f32.mxu0 %vm3023_vm9, %v3022_v14  ;;  %2703 = vmatprep.mubr.msk.f32.mxu1 %vm3023_vm9, %v3022_v14 }
 0x3ca   :  { %2706 = vmatprep.subr.mxu0 %v3022_v14  ;;  %2717 = vmatprep.subr.mxu1 %v3022_v14 }
 0x3cb   :  { %2693 = vmatmul.mubr.f32.vlgmr.msra.gmra.mxu0 %v1451_v15  ;;  %2704 = vmatmul.mubr.f32.vlgmr.msra.gmra.mxu1 %v1452_v17  ;;  %v2861_v17 = vld [vmem:[#allocation2 + $0x28] sm:$0xff] }
 0x3cc   :  { %1251 = vperm.xlu0 %2807, %v1221_v18   ;;  %2707 = vmatpush3.msra.mxu0 %v1487_v53 }
 0x3cd   :  { %2718 = vmatpush3.msra.mxu1 %v3405_v45  ;;  %2708 = vmatprep.subr.mxu0 %v3022_v14  ;;  %v2012_v45 = vand.u32 4294901760, %v2011_v50 }
 0x3ce   :  { %2719 = vmatprep.subr.mxu1 %v3022_v14  ;;  %2709 = vmatpush3.msra.mxu0 %v1494_v63  ;;  %v2859_v63 = vld [vmem:[#allocation2 + $0x18] sm:$0xff] }
 0x3cf   :  { %2720 = vmatpush3.msra.mxu1 %v3411_v56  ;;  %2710 = vmatprep.subr.mxu0 %v3022_v14  ;;  %v2857_v56 = vld [vmem:[#allocation2] sm:$0xff] }
 0x3d0   :  { %1254 = vperm.xlu0 %2807, %v1223_v11   ;;  %2721 = vmatprep.subr.mxu1 %v3022_v14 }
 0x3d1   :  { %2711 = vmatpush3.msra.mxu0 %v1501_v20  ;;  %2722 = vmatpush3.msra.mxu1 %v3417_v58 }
 0x3d2   :  { %2712 = vmatprep.subr.mxu0 %v3022_v14  ;;  %2723 = vmatprep.subr.mxu1 %v3022_v14 }
 0x3d3   :  { %2713 = vmatpush3.msra.mxu0 %v1508_v5  ;;  %2714 = vmatprep.mubr.msk.f32.mxu0 %vm3023_vm9, %v3022_v14 }
 0x3d4   :  { %2724 = vmatpush3.msra.mxu1 %v3427_v1  ;;  %2715 = vmatmul.mubr.f32.vlgmr.msra.gmra.mxu0 %v3440_v33 }
 0x3d5   :  { %2725 = vmatprep.mubr.msk.f32.mxu1 %vm3023_vm9, %v3022_v14  ;;  %2739 = vmatprep.subr.mxu1 %v3022_v14 }
 0x3d6   :  { %2726 = vmatmul.mubr.f32.vlgmr.msra.gmra.mxu1 %v3440_v33  ;;  %2728 = vmatprep.subr.mxu0 %v3022_v14 }
 0x3d7   :  { %2740 = vmatpush3.msra.mxu1 %v1991_v35  ;;  %2747 = vmatprep.mubr.msk.f32.mxu1 %vm3023_vm9, %v3022_v14 }
 0x3d8   :  { %2741 = vmatprep.subr.mxu1 %v3022_v14  ;;  %2729 = vmatpush3.msra.mxu0 %v3477_v23 }
 0x3d9   :  { %2742 = vmatpush3.msra.mxu1 %v1998_v48  ;;  %2730 = vmatprep.subr.mxu0 %v3022_v14 }
 0x3da   :  { %2743 = vmatprep.subr.mxu1 %v3022_v14  ;;  %2731 = vmatpush3.msra.mxu0 %v3486_v31 }
 0x3db   :  { %2744 = vmatpush3.msra.mxu1 %v2005_v51  ;;  %2732 = vmatprep.subr.mxu0 %v3022_v14  ;;  %v2862_v51 = vld [vmem:[#allocation2 + $0x30] sm:$0xff] }
 0x3dc   :  { %2745 = vmatprep.subr.mxu1 %v3022_v14  ;;  %2733 = vmatpush3.msra.mxu0 %v3497_v39 }
 0x3dd   :  { %2746 = vmatpush3.msra.mxu1 %v2012_v45  ;;  %2734 = vmatprep.subr.mxu0 %v3022_v14 }
 0x3de   :  { %2761 = vmatprep.subr.mxu1 %v3022_v14  ;;  %2735 = vmatpush3.msra.mxu0 %v3505_v43 }
 0x3df   :  { %2736 = vmatprep.mubr.msk.f32.mxu0 %vm3023_vm9, %v3022_v14  ;;  %2750 = vmatprep.subr.mxu0 %v3022_v14 }
 0x42f   :  { %v1234_v52 = vpop.permute.xlu0 %1233 }
 0x430   :  { %v1305_v6 = vmul.f32 %v2857_v56, %v1234_v52  ;;  %v1259_v21 = vrot.slane %v1234_v52, %v3308_v8 }
 0x432   :  { %v1313_v60 = vsel %vm108_vm0, %v1305_v6, 0.0 }
 0x433   :  { %v1237_v54 = vpop.permute.xlu0 %1236  ;;  %v1314_v2 = vrot.slane %v1313_v60, 4 }
 0x434   :  { %v1306_v55 = vmul.f32 %v2856_v49, %v1237_v54  ;;  %v1263_v16 = vrot.slane %v1237_v54, %v3308_v8 }
 0x435   :  { %v1315_v3 = vadd.f32 %v1314_v2, %v1313_v60  ;;  %v2863_v2 = vld [vmem:[#allocation2 + $0x38] sm:$0xff] }
 0x436   :  { %v1320_v59 = vsel %vm108_vm0, %v1306_v55, 0.0  ;;  %v1288_v38 = vsel %vm1008_vm1, %v1263_v16, %v1259_v21 }
 0x437   :  { %v1240_v53 = vpop.permute.xlu0 %1239  ;;  %v1321_v1 = vrot.slane %v1320_v59, 4  ;;  %v1316_v11 = vrot.slane %v1315_v3, 2 }
 0x438   :  { %v1307_v58 = vmul.f32 %v2858_v57, %v1240_v53  ;;  %v1267_v24 = vrot.slane %v1240_v53, %v3308_v8 }
 0x439   :  { %v1322_v34 = vadd.f32 %v1321_v1, %v1320_v59  ;;  %v1317_v56 = vadd.f32 %v1316_v11, %v1315_v3 }
 0x43a   :  { %v1327_v61 = vsel %vm108_vm0, %v1307_v58, 0.0  ;;  %v1289_v54 = vsel %vm1010_vm2, %v1267_v24, %v1288_v38 }
 0x43b   :  { %v1243_v62 = vpop.permute.xlu0 %1242  ;;  %v1328_v13 = vrot.slane %v1327_v61, 4  ;;  %v1323_v22 = vrot.slane %v1322_v34, 2 }
 0x43c   :  { %v1308_v0 = vmul.f32 %v2859_v63, %v1243_v62  ;;  %v1271_v27 = vrot.slane %v1243_v62, %v3308_v8 }
 0x43d   :  { %v1329_v4 = vadd.f32 %v1328_v13, %v1327_v61  ;;  %v1324_v52 = vadd.f32 %v1323_v22, %v1322_v34 }
 0x43e   :  { %v1334_v7 = vsel %vm108_vm0, %v1308_v0, 0.0  ;;  %v1290_v53 = vsel %vm1012_vm3, %v1271_v27, %v1289_v54 }
 0x43f   :  { %v1335_v19 = vrot.slane %v1334_v7, 4  ;;  %v1246_v20 = vpop.permute.xlu0 %1245  ;;  %v1330_v12 = vrot.slane %v1329_v4, 2 }
 0x440   :  { %v1309_v33 = vmul.f32 %v2860_v30, %v1246_v20  ;;  %v1275_v46 = vrot.slane %v1246_v20, %v3308_v8 }
 0x441   :  { %v1336_v9 = vadd.f32 %v1335_v19, %v1334_v7  ;;  %v1331_v6 = vadd.f32 %v1330_v12, %v1329_v4  ;;  %v1325_v7 = vrot.slane %v1324_v52, 1  ;;  %v1318_v4 = vrot.slane %v1317_v56, 1 }
 0x442   :  { %v1341_v5 = vsel %vm108_vm0, %v1309_v33, 0.0  ;;  %v1291_v59 = vsel %vm1014_vm4, %v1275_v46, %v1290_v53 }
 0x443   :  { %v1342_v15 = vrot.slane %v1341_v5, 4  ;;  %v1249_v10 = vpop.permute.xlu0 %1248  ;;  %v1337_v41 = vrot.slane %v1336_v9, 2  ;;  %v1332_v33 = vrot.slane %v1331_v6, 1  ;;  %v1319_v22 = vadd.f32 %v1318_v4, %v1317_v56 }
 0x444   :  { %v1310_v18 = vmul.f32 %v2861_v17, %v1249_v10  ;;  %v1279_v50 = vrot.slane %v1249_v10, %v3308_v8 }
 0x445   :  { %v1343_v26 = vadd.f32 %v1342_v15, %v1341_v5  ;;  %v1338_v58 = vadd.f32 %v1337_v41, %v1336_v9  ;;  %v1333_v21 = vadd.f32 %v1332_v33, %v1331_v6 }
 0x446   :  { %v1348_v36 = vsel %vm108_vm0, %v1310_v18, 0.0  ;;  %v1292_v0 = vsel %vm1016_vm5, %v1279_v50, %v1291_v59 }
 0x447   :  { %v1349_v32 = vrot.slane %v1348_v36, 4  ;;  %v1252_v35 = vpop.permute.xlu0 %1251  ;;  %v1344_v48 = vrot.slane %v1343_v26, 2  ;;  %v1339_v5 = vrot.slane %v1338_v58, 1 }
 0x448   :  { %v1311_v45 = vmul.f32 %v2862_v51, %v1252_v35  ;;  %v1283_v55 = vrot.slane %v1252_v35, %v3308_v8 }
 0x449   :  { %v1350_v49 = vadd.f32 %v1349_v32, %v1348_v36  ;;  %v1345_v63 = vadd.f32 %v1344_v48, %v1343_v26  ;;  %v1340_v24 = vadd.f32 %v1339_v5, %v1338_v58 }
 0x44a   :  { %v1355_v57 = vsel %vm108_vm0, %v1311_v45, 0.0  ;;  %v1293_v30 = vsel %vm1018_vm6, %v1283_v55, %v1292_v0 }
 0x44b   :  { %v1351_v60 = vrot.slane %v1350_v49, 2  ;;  %v1356_v61 = vrot.slane %v1355_v57, 4  ;;  %v1255_v62 = vpop.permute.xlu0 %1254  ;;  %v1346_v10 = vrot.slane %v1345_v63, 1 }
 0x44c   :  { %v1287_v1 = vrot.slane %v1255_v62, %v3308_v8  ;;  %v1312_v13 = vmul.f32 %v2863_v2, %v1255_v62  ;;  %v1326_v8 = vadd.f32 %v1325_v7, %v1324_v52 }
 0x44d   :  { %v1352_v19 = vadd.f32 %v1351_v60, %v1350_v49  ;;  %v1357_v20 = vadd.f32 %v1356_v61, %v1355_v57  ;;  %v1347_v12 = vadd.f32 %v1346_v10, %v1345_v63 }
 0x44e   :  { %v1362_v34 = vsel %vm108_vm0, %v1312_v13, 0.0  ;;  %v1294_v3 = vsel %vm1020_vm7, %v1287_v1, %v1293_v30  ;;  %v1874_v27 = vsel %vm1008_vm1, %v1326_v8, %v1319_v22 }
 0x44f   :  { %v1358_v9 = vrot.slane %v1357_v20, 2  ;;  %v1363_v15 = vrot.slane %v1362_v34, 4  ;;  %1296 = vst.msk [vmem:[#allocation12] sm:$0xff] %vm1023_vm8, %v1294_v3  ;;  %v1353_v16 = vrot.slane %v1352_v19, 1  ;;  %v1875_v46 = vsel %vm1010_vm2, %v1333_v21, %v1874_v27 }
 0x450   :  { %v1876_v35 = vsel %vm1012_vm3, %v1340_v24, %v1875_v46 }
 0x451   :  { %v1359_v17 = vadd.f32 %v1358_v9, %v1357_v20  ;;  %v1364_v18 = vadd.f32 %v1363_v15, %v1362_v34  ;;  %v1354_v36 = vadd.f32 %v1353_v16, %v1352_v19  ;;  %v1877_v48 = vsel %vm1014_vm4, %v1347_v12, %v1876_v35 }
 0x453   :  { %v1360_v26 = vrot.slane %v1359_v17, 1  ;;  %v1365_v11 = vrot.slane %v1364_v18, 2  ;;  %v1878_v50 = vsel %vm1016_vm5, %v1354_v36, %v1877_v48 }
 0x455   :  { %v1366_v41 = vadd.f32 %v1365_v11, %v1364_v18  ;;  %v1361_v32 = vadd.f32 %v1360_v26, %v1359_v17 }
 0x457   :  { %v1367_v38 = vrot.slane %v1366_v41, 1  ;;  %v1879_v45 = vsel %vm1018_vm6, %v1361_v32, %v1878_v50 }
 0x459   :  { %v1368_v51 = vadd.f32 %v1367_v38, %v1366_v41 }
 0x45b   :  { %v1880_v52 = vsel %vm1020_vm7, %v1368_v51, %v1879_v45 }
 0x45c   :  { %v1881_v54 = vsel %vm108_vm0, %v1880_v52, 0 }
 0x45d   :  { %v1952_v49 = vand.u32 4294901760, %v1881_v54 }
 0x45f   :  { %v1953_v55 = vsub.f32 %v1881_v54, %v1952_v49  ;;  %2748 = vmatmul.mubr.f32.vlgmr.msra.gmra.mxu1 %v1952_v49 }
 0x460   :  { %2762 = vmatpush3.msra.mxu1 %v3477_v23  ;;  %2769 = vmatprep.mubr.msk.f32.mxu1 %vm3023_vm9, %v3022_v14 }
 0x461   :  { %2763 = vmatprep.subr.mxu1 %v3022_v14  ;;  %v1954_v56 = vand.u32 4294901760, %v1953_v55 }
 0x462   :  { %2764 = vmatpush3.msra.mxu1 %v3486_v31 }
 0x463   :  { %2765 = vmatprep.subr.mxu1 %v3022_v14  ;;  %v1955_v6 = vsub.f32 %v1953_v55, %v1954_v56 }
 0x464   :  { %2766 = vmatpush3.msra.mxu1 %v3497_v39 }
 0x465   :  { %2767 = vmatprep.subr.mxu1 %v3022_v14  ;;  %v1956_v53 = vand.u32 4294901760, %v1955_v6 }
 0x466   :  { %2768 = vmatpush3.msra.mxu1 %v3505_v43 }
 0x467   :  { %2770 = vmatmul.mubr.f32.vlgmr.msra.gmra.mxu1 %v1954_v56  ;;  %2783 = vmatprep.subr.mxu1 %v3022_v14 }
 0x468   :  { %2737 = vmatmul.mubr.f32.vlgmr.msra.gmra.mxu0 %v1956_v53  ;;  %2784 = vmatpush3.msra.mxu1 %v3477_v23 }
 0x469   :  { %2751 = vmatpush3.msra.mxu0 %v3484_v25  ;;  %2785 = vmatprep.subr.mxu1 %v3022_v14 }
 0x46a   :  { %2752 = vmatprep.subr.mxu0 %v3022_v14  ;;  %2786 = vmatpush3.msra.mxu1 %v3486_v31 }
 0x46b   :  { %2753 = vmatpush3.msra.mxu0 %v3495_v37  ;;  %2787 = vmatprep.subr.mxu1 %v3022_v14 }
 0x46c   :  { %2754 = vmatprep.subr.mxu0 %v3022_v14  ;;  %2788 = vmatpush3.msra.mxu1 %v3497_v39 }
 0x46d   :  { %2755 = vmatpush3.msra.mxu0 %v3503_v42  ;;  %2789 = vmatprep.subr.mxu1 %v3022_v14 }
 0x46e   :  { %2756 = vmatprep.subr.mxu0 %v3022_v14  ;;  %2758 = vmatprep.mubr.msk.f32.mxu0 %vm3023_vm9, %v3022_v14 }
 0x46f   :  { %2757 = vmatpush3.msra.mxu0 %v3514_v28  ;;  %2790 = vmatpush3.msra.mxu1 %v3505_v43 }
 0x470   :  { %2791 = vmatprep.mubr.msk.f32.mxu1 %vm3023_vm9, %v3022_v14  ;;  %2759 = vmatmul.mubr.f32.vlgmr.msra.gmra.mxu0 %v1953_v55 }
 0x471   :  { %2772 = vmatprep.subr.mxu0 %v3022_v14  ;;  %2792 = vmatmul.mubr.f32.vlgmr.msra.gmra.mxu1 %v1952_v49 }
 0x472   :  { %2773 = vmatpush3.msra.mxu0 %v1989_v40  ;;  %2780 = vmatprep.mubr.msk.f32.mxu0 %vm3023_vm9, %v3022_v14 }
 0x473   :  { %2774 = vmatprep.subr.mxu0 %v3022_v14 }
 0x474   :  { %2775 = vmatpush3.msra.mxu0 %v1996_v44 }
 0x475   :  { %2776 = vmatprep.subr.mxu0 %v3022_v14 }
 0x476   :  { %2777 = vmatpush3.msra.mxu0 %v2003_v29 }
 0x477   :  { %2778 = vmatprep.subr.mxu0 %v3022_v14 }
 0x478   :  { %2779 = vmatpush3.msra.mxu0 %v2010_v47 }
 0x479   :  { %2781 = vmatmul.mubr.f32.vlgmr.msra.gmra.mxu0 %v1952_v49 }
 0x47f   :  { %v1456_v23 = vpop.f32.mrf.mxu0 }
 0x480   :  { %v1547_v25 = vpop.f32.mrf.mxu1 }
 0x481   :  { %v2672_v31 = vpop.f32.mrf.mxu0  ;;  %v1548_v39 = vadd.f32 %v1547_v25, %v1456_v23 }
 0x482   :  { %v2683_v40 = vpop.f32.mrf.mxu1 }
 0x48b   :  { %v1627_v43 = vpop.f32.mrf.mxu0  ;;  %v1704_v57 = vpop.f32.mrf.mxu1 }
 0x48c   :  { %v1628_v37 = vadd.f32 %v1627_v43, %v1548_v39 }
 0x48d   :  { %v2694_v44 = vpop.f32.mrf.mxu0  ;;  %v2705_v58 = vpop.f32.mrf.mxu1 }
 0x48e   :  { %v1705_v59 = vadd.f32 %v1704_v57, %v1628_v37 }
 0x494   :  { %v1787_v60 = vpop.f32.mrf.mxu0 }
 0x495   :  { %v1788_v42 = vadd.f32 %v1787_v60, %v1705_v59 }
 0x496   :  { %v1862_v29 = vpop.f32.mrf.mxu1  ;;  %v2716_v61 = vpop.f32.mrf.mxu0 }
 0x497   :  { %v1863_v14 = vadd.f32 %v1862_v29, %v1788_v42 }
 0x498   :  { %v2727_v62 = vpop.f32.mrf.mxu1 }
 0x499   :  { %2975 = shalt.err (!%p2972_p1)
}
 0x49a   :  { %2396 = dma.vmem_to_hbm [thread:$0]  %s2394_s29, 128, %s3659_s8, [#allocation13]   ;;  %v2409_v9 = vld [vmem:[%s3657_s6] ss:$0 sm:$0xff] }
 0x49b   :  { %s3025_s8 = smov [#allocation11]  }
 0x49c   :  { %s2383_s13 = sshll.u32 %s3025_s8, 4  ;;  %s2384_s13 = int_to_ptr.vmem [resolvable:$true] %s2383_s13 }
 0x49d   :  { %s2984_s14 = scalar_lea.vmem %s2384_s13, 128  ;;  %p2989_p3 = scmp.lt.s32.totalorder %s2384_s13, %s2384_s13 }
 0x49e   :  { %p2985_p2 = scmp.ne.s32.totalorder %s2384_s13, %s2984_s14  ;;  %p2990_p4 = scmp.lt.s32.totalorder %s2984_s14, %s2984_s14 }
 0x4a0   :  { %p2991_p5 = por %p2990_p4, %p2989_p3 }
 0x4a2   :  { %p2992_p6 = pnand %p2991_p5, %p2985_p2 }
 0x51f   :  { %v2049_v28 = vpop.f32.mrf.mxu1 }
 0x521   :  { %v2749_v47 = vpop.f32.mrf.mxu1 }
 0x527   :  { %v2206_v63 = vpop.f32.mrf.mxu1 }
 0x528   :  { %v1958_v0 = vpop.f32.mrf.mxu0 }
 0x529   :  { %v2771_v1 = vpop.f32.mrf.mxu1  ;;  %v1959_v13 = vadd.f32 %v1958_v0, %v1863_v14 }
 0x52a   :  { %v2738_v2 = vpop.f32.mrf.mxu0 }
 0x52b   :  { %v2050_v20 = vadd.f32 %v2049_v28, %v1959_v13 }
 0x530   :  { %v2129_v7 = vpop.f32.mrf.mxu0 }
 0x531   :  { %v2364_v19 = vpop.f32.mrf.mxu1  ;;  %v2130_v34 = vadd.f32 %v2129_v7, %v2050_v20 }
 0x532   :  { %v2760_v30 = vpop.f32.mrf.mxu0 }
 0x533   :  { %v2793_v33 = vpop.f32.mrf.mxu1  ;;  %v2207_v3 = vadd.f32 %v2206_v63, %v2130_v34 }
 0x539   :  { %v2289_v4 = vpop.f32.mrf.mxu0 }
 0x53a   :  { %v2290_v5 = vadd.f32 %v2289_v4, %v2207_v3 }
 0x53b   :  { %v2782_v15 = vpop.f32.mrf.mxu0 }
 0x53c   :  { %v2365_v10 = vadd.f32 %v2364_v19, %v2290_v5 }
 0x53e   :  { %v2375_v8 = vadd.f32 %v2409_v9, %v2365_v10 }
 0x540   :  { %2376 = vst.msk [vmem:[#allocation11] sm:$0xff] %vm108_vm0, %v2375_v8 }
 0x541   :  { %2995 = shalt.err (!%p2992_p6)
}
 0x542   :  { %2386 = dma.vmem_to_hbm [thread:$0]  %s2384_s13, 128, %s3658_s7, [#allocation4]  }
 0x543   :  { %3010 = dma.done.wait [#allocation4], 128  }
 0x544   :  { %3011 = vsyncadd [#allocation4], 4294967168 }
 0x545   :  { %3012 = dma.done.wait [#allocation13], 128  }
 0x546   :  { %3013 = vsyncadd [#allocation13], 4294967168 }
 0x547   :  { %2403 = vsyncpa [#allocation3], 1 }
 0x548   :  { %2404 = vsyncpa [#allocation6], 1 }
 0x549   :  { %2405 = vsyncpa [#allocation9], 1 }
 0x54a   :  { %2406 = vsyncpa [#allocation4], 1 }
 0x54b   :  { %2407 = vsyncpa [#allocation13], 1 }

</bundles_post_ra>
